<compile_context>
chip_gen: v7x
topology: tpu7x:2x2x1
jax: 0.10.0
libtpu: 0.0.40
codegen_flags: <defaults>
</compile_context>

<pallas_src>
import functools

import jax
import jax.numpy as jnp
from jax.experimental import pallas as pl
from jax.experimental.pallas import tpu as pltpu

IN_DIM = 256
HID1 = 512
HID2 = 1024
LANE = 128
SUBLANE = 8              # f32 sublane granularity (x and output are f32)
NEG_INF = -1e30
MIB = 1024 * 1024
VMEM_CAP = 48 * MIB      # below v7x's 64 MiB physical VMEM, leaves Mosaic headroom
VMEM_FLOOR = 32 * MIB    # raises v5e's 16 MiB / v6e's 32 MiB scoped default


def _round_up(x, m):
    return (x + m - 1) // m * m


# --------------------------------------------------------------------------- #
# kernel
# --------------------------------------------------------------------------- #
def tac_policy_kernel(x_ref, w1_ref, b1_ref, w2_ref, b2_ref, w3_ref, b3_ref, o_ref):
    # x tile: (tb, 256) f32 -> cast to bf16 in-kernel (cheap VPU work, hidden under MXU).
    x = x_ref[...].astype(jnp.bfloat16)

    h1 = jnp.dot(x, w1_ref[...], preferred_element_type=jnp.float32)        # (tb, 512)
    h1 = jnp.maximum(h1 + b1_ref[...], 0.0)                                  # f32

    h2 = jnp.dot(h1.astype(jnp.bfloat16), w2_ref[...],
                 preferred_element_type=jnp.float32)                         # (tb, 1024)
    h2 = jnp.maximum(h2 + b2_ref[...], 0.0)                                  # f32

    logits = jnp.dot(h2.astype(jnp.bfloat16), w3_ref[...],
                     preferred_element_type=jnp.float32)                     # (tb, Tp)
    logits = logits + b3_ref[...]            # padded lanes carry a -1e30 bias

    # numerically stable softmax over the tactic axis (== PyTorch dim=1)
    m = jnp.max(logits, axis=-1, keepdims=True)
    e = jnp.exp(logits - m)
    denom = jnp.sum(e, axis=-1, keepdims=True)
    inv = pl.reciprocal(denom, approx=True)      # EUP vrcp (free bundle slot)
    inv = inv * (2.0 - denom * inv)              # one Newton step -> ~f32-accurate
    o_ref[...] = (e * inv).astype(o_ref.dtype)


# --------------------------------------------------------------------------- #
# host-side helpers
# --------------------------------------------------------------------------- #
def prepare_params(params):
    """Cast weights to bf16, make biases (1, N) f32, pad tactic dim to 128 lanes."""
    w1, b1, w2, b2, w3, b3 = params            # f32, weights (in, out), biases 1-D
    T = int(w3.shape[1])
    t_pad = _round_up(T, LANE)
    if t_pad != T:
        w3 = jnp.pad(w3, ((0, 0), (0, t_pad - T)))
        b3 = jnp.pad(b3, ((0, t_pad - T),), constant_values=NEG_INF)
    prep = (
        w1.astype(jnp.bfloat16), b1.astype(jnp.float32).reshape(1, -1),
        w2.astype(jnp.bfloat16), b2.astype(jnp.float32).reshape(1, -1),
        w3.astype(jnp.bfloat16), b3.astype(jnp.float32).reshape(1, -1),
    )
    return prep, T


def _vmem_needed(tile_b, t_pad):
    """Conservative VMEM footprint estimate (weights counted double-buffered)."""
    weight_bytes = 2 * (IN_DIM * HID1 + HID1 * HID2 + HID2 * t_pad) \
                   + 4 * (HID1 + HID2 + t_pad)                      # bf16 W, f32 b
    io_bytes = 2 * (tile_b * IN_DIM * 4 + tile_b * t_pad * 4)       # 2x x/out f32 tiles
    temp_bytes = 4 * tile_b * (HID1 + HID2 + 2 * t_pad)             # h1/h2/logits/e f32
    return 2 * weight_bytes + io_bytes + temp_bytes


def _select_tile_b(B, tile_b, t_pad):
    # start from the requested tile, shrunk to the (padded) batch
    tb = _round_up(min(tile_b, max(B, 1)), SUBLANE)
    # v7x megacore: guarantee >= 2 grid steps whenever the batch spans >= 2 sublane
    # tiles so the "parallel" batch axis shards across both TensorCores.
    if _round_up(B, SUBLANE) >= 2 * SUBLANE:
        half = _round_up((B + 1) // 2, SUBLANE)
        tb = min(tb, half)
    # shrink further if the estimated footprint would exceed the VMEM cap
    while tb > SUBLANE and _vmem_needed(tb, t_pad) > VMEM_CAP:
        tb = max(SUBLANE, _round_up(tb // 2, SUBLANE))
    return tb


def _build_call(tile_b, t_pad, b_pad, vmem_limit):
    def resident(shape):     # constant index_map -> fetched once, stays resident
        return pl.BlockSpec(shape, lambda i: (0, 0))

    return pl.pallas_call(
        tac_policy_kernel,
        out_shape=jax.ShapeDtypeStruct((b_pad, t_pad), jnp.float32),
        grid_spec=pltpu.PrefetchScalarGridSpec(
            num_scalar_prefetch=0,
            grid=(b_pad // tile_b,),
            in_specs=[
                pl.BlockSpec((tile_b, IN_DIM), lambda i: (i, 0)),   # x tile (f32)
                resident((IN_DIM, HID1)),                            # W1 bf16
                resident((1, HID1)),                                 # b1 f32
                resident((HID1, HID2)),                              # W2 bf16
                resident((1, HID2)),                                 # b2 f32
                resident((HID2, t_pad)),                             # W3 bf16 (lane-padded)
                resident((1, t_pad)),                                # b3 f32 (lane-padded)
            ],
            out_specs=pl.BlockSpec((tile_b, t_pad), lambda i: (i, 0)),
        ),
        compiler_params=pltpu.CompilerParams(
            dimension_semantics=("parallel",),
            vmem_limit_bytes=vmem_limit,
        ),
    )


@functools.partial(jax.jit, static_argnames=("tile_b", "t_orig"))
def _tac_policy_jit(x, w1, b1, w2, b2, w3, b3, *, tile_b, t_orig):
    """Pad -> fused pallas_call -> un-pad, all inside one jit so the pre/post fuse."""
    B = x.shape[0]
    t_pad = w3.shape[1]

    tb = _select_tile_b(B, tile_b, t_pad)
    b_pad = _round_up(B, tb)
    needed = _vmem_needed(tb, t_pad)
    vmem_limit = int(min(max(needed * 5 // 4, VMEM_FLOOR), VMEM_CAP))

    x_p = x if b_pad == B else jnp.pad(x, ((0, b_pad - B), (0, 0)))
    out = _build_call(tb, t_pad, b_pad, vmem_limit)(x_p, w1, b1, w2, b2, w3, b3)
    return out[:B, :t_orig]


def tac_policy_forward(x, params, *, tile_b=512):
    """x: (B, 256) f32. params: f32 (in,out) weights + 1-D biases.
    Returns (B, tactic_size) f32 softmax probabilities."""
    (w1, b1, w2, b2, w3, b3), T = prepare_params(params)
    return _tac_policy_jit(x, w1, b1, w2, b2, w3, b3, tile_b=int(tile_b), t_orig=T)


# --------------------------------------------------------------------------- #
# params + reference
# --------------------------------------------------------------------------- #
def init_params(key, tactic_size):
    """Deterministic synthetic params (PyTorch nn.Linear-like uniform init),
    stored as (in_features, out_features) f32 weights and 1-D f32 biases."""
    ks = jax.random.split(key, 6)

    def linear(kw, kb, fan_in, fan_out):
        bound = 1.0 / jnp.sqrt(fan_in)
        w = jax.random.uniform(kw, (fan_in, fan_out), jnp.float32, -bound, bound)
        b = jax.random.uniform(kb, (fan_out,), jnp.float32, -bound, bound)
        return w, b

    w1, b1 = linear(ks[0], ks[1], IN_DIM, HID1)
    w2, b2 = linear(ks[2], ks[3], HID1, HID2)
    w3, b3 = linear(ks[4], ks[5], HID2, tactic_size)
    return (w1, b1, w2, b2, w3, b3)


def reference_forward(x, params):
    """Reference with the same numeric recipe as the kernel
    (bf16 matmuls, f32 accumulation, f32 elementwise + softmax)."""
    w1, b1, w2, b2, w3, b3 = params

    def mm(a, w):
        return jnp.dot(a.astype(jnp.bfloat16), w.astype(jnp.bfloat16),
                       preferred_element_type=jnp.float32)

    h1 = jnp.maximum(mm(x, w1) + b1, 0.0)
    h2 = jnp.maximum(mm(h1, w2) + b2, 0.0)
    logits = mm(h2, w3) + b3
    return jax.nn.softmax(logits, axis=1)


if __name__ == "__main__":
    key = jax.random.PRNGKey(0)
    k_x, k_p = jax.random.split(key)

    batch = 20          # deliberately not a multiple of the sublane tile
    tactic_size = 200   # deliberately not a multiple of 128 lanes

    x = jax.random.normal(k_x, (batch, IN_DIM), jnp.float32)
    params = init_params(k_p, tactic_size)

    out = tac_policy_forward(x, params, tile_b=512)
    out = jax.block_until_ready(out)

    ref = reference_forward(x, params)
    assert out.shape == (batch, tactic_size)
    assert jnp.allclose(out, ref, atol=5e-4, rtol=5e-4), "mismatch vs reference"
    assert jnp.allclose(jnp.sum(out, axis=1), 1.0, atol=1e-4), "softmax rows must sum to 1"

    print("KERNEL_OK")
</pallas_src>

<mosaic_0001>
module attributes {stable_mosaic.version = 11 : i64} {
  func.func @tac_policy_kernel(%arg0: i32, %arg1: memref<16x256xf32, #tpu.memory_space<vmem>>, %arg2: memref<256x512xbf16, #tpu.memory_space<vmem>>, %arg3: memref<1x512xf32, #tpu.memory_space<vmem>>, %arg4: memref<512x1024xbf16, #tpu.memory_space<vmem>>, %arg5: memref<1x1024xf32, #tpu.memory_space<vmem>>, %arg6: memref<1024x256xbf16, #tpu.memory_space<vmem>>, %arg7: memref<1x256xf32, #tpu.memory_space<vmem>>, %arg8: memref<16x256xf32, #tpu.memory_space<vmem>>) attributes {dimension_semantics = [#tpu.dimension_semantics<parallel>], iteration_bounds = array<i64: 2>, scalar_prefetch = 0 : i64, scratch_operands = 0 : i64, tpu.core_type = #tpu.core_type<tc>, window_params = [{transform_indices = @transform_0, window_bounds = array<i64: 16, 256>}, {pipeline_mode = #tpu.pipeline_mode<synchronous>, transform_indices = @transform_1, window_bounds = array<i64: 256, 512>}, {pipeline_mode = #tpu.pipeline_mode<synchronous>, transform_indices = @transform_2, window_bounds = array<i64: 1, 512>}, {pipeline_mode = #tpu.pipeline_mode<synchronous>, transform_indices = @transform_3, window_bounds = array<i64: 512, 1024>}, {pipeline_mode = #tpu.pipeline_mode<synchronous>, transform_indices = @transform_4, window_bounds = array<i64: 1, 1024>}, {pipeline_mode = #tpu.pipeline_mode<synchronous>, transform_indices = @transform_5, window_bounds = array<i64: 1024, 256>}, {pipeline_mode = #tpu.pipeline_mode<synchronous>, transform_indices = @transform_6, window_bounds = array<i64: 1, 256>}, {transform_indices = @transform_7, window_bounds = array<i64: 16, 256>}]} {
    %c0 = arith.constant 0 : index
    %c0_0 = arith.constant 0 : index
    %0 = vector.load %arg1[%c0, %c0_0] : memref<16x256xf32, #tpu.memory_space<vmem>>, vector<16x256xf32>
    %1 = arith.truncf %0 : vector<16x256xf32> to vector<16x256xbf16>
    %c0_1 = arith.constant 0 : index
    %c0_2 = arith.constant 0 : index
    %2 = vector.load %arg2[%c0_1, %c0_2] : memref<256x512xbf16, #tpu.memory_space<vmem>>, vector<256x512xbf16>
    %cst = arith.constant dense<0.000000e+00> : vector<16x512xf32>
    %3 = tpu.matmul %1, %2, %cst {dimension_numbers = #tpu.dot_dimension_numbers<[1], [0], [0], [1], [0, 0, 1, 1], [], []>} : vector<16x256xbf16>, vector<256x512xbf16>, vector<16x512xf32> -> vector<16x512xf32>
    %c0_3 = arith.constant 0 : index
    %c0_4 = arith.constant 0 : index
    %4 = vector.load %arg3[%c0_3, %c0_4] : memref<1x512xf32, #tpu.memory_space<vmem>>, vector<1x512xf32>
    %5 = vector.broadcast %4 : vector<1x512xf32> to vector<16x512xf32>
    %6 = arith.addf %3, %5 : vector<16x512xf32>
    %cst_5 = arith.constant 0.000000e+00 : f32
    %7 = vector.broadcast %cst_5 : f32 to vector<16x512xf32>
    %8 = arith.maximumf %6, %7 : vector<16x512xf32>
    %9 = arith.truncf %8 : vector<16x512xf32> to vector<16x512xbf16>
    %c0_6 = arith.constant 0 : index
    %c0_7 = arith.constant 0 : index
    %10 = vector.load %arg4[%c0_6, %c0_7] : memref<512x1024xbf16, #tpu.memory_space<vmem>>, vector<512x1024xbf16>
    %cst_8 = arith.constant dense<0.000000e+00> : vector<16x1024xf32>
    %11 = tpu.matmul %9, %10, %cst_8 {dimension_numbers = #tpu.dot_dimension_numbers<[1], [0], [0], [1], [0, 0, 1, 1], [], []>} : vector<16x512xbf16>, vector<512x1024xbf16>, vector<16x1024xf32> -> vector<16x1024xf32>
    %c0_9 = arith.constant 0 : index
    %c0_10 = arith.constant 0 : index
    %12 = vector.load %arg5[%c0_9, %c0_10] : memref<1x1024xf32, #tpu.memory_space<vmem>>, vector<1x1024xf32>
    %13 = vector.broadcast %12 : vector<1x1024xf32> to vector<16x1024xf32>
    %14 = arith.addf %11, %13 : vector<16x1024xf32>
    %cst_11 = arith.constant 0.000000e+00 : f32
    %15 = vector.broadcast %cst_11 : f32 to vector<16x1024xf32>
    %16 = arith.maximumf %14, %15 : vector<16x1024xf32>
    %17 = arith.truncf %16 : vector<16x1024xf32> to vector<16x1024xbf16>
    %c0_12 = arith.constant 0 : index
    %c0_13 = arith.constant 0 : index
    %18 = vector.load %arg6[%c0_12, %c0_13] : memref<1024x256xbf16, #tpu.memory_space<vmem>>, vector<1024x256xbf16>
    %cst_14 = arith.constant dense<0.000000e+00> : vector<16x256xf32>
    %19 = tpu.matmul %17, %18, %cst_14 {dimension_numbers = #tpu.dot_dimension_numbers<[1], [0], [0], [1], [0, 0, 1, 1], [], []>} : vector<16x1024xbf16>, vector<1024x256xbf16>, vector<16x256xf32> -> vector<16x256xf32>
    %c0_15 = arith.constant 0 : index
    %c0_16 = arith.constant 0 : index
    %20 = vector.load %arg7[%c0_15, %c0_16] : memref<1x256xf32, #tpu.memory_space<vmem>>, vector<1x256xf32>
    %21 = vector.broadcast %20 : vector<1x256xf32> to vector<16x256xf32>
    %22 = arith.addf %19, %21 : vector<16x256xf32>
    %cst_17 = arith.constant dense<0xFF800000> : vector<16xf32>
    %23 = vector.multi_reduction <maximumf>, %22, %cst_17 [1] : vector<16x256xf32> to vector<16xf32>
    %24 = vector.shape_cast %23 : vector<16xf32> to vector<16x1xf32>
    %25 = vector.broadcast %24 : vector<16x1xf32> to vector<16x256xf32>
    %26 = arith.subf %22, %25 : vector<16x256xf32>
    %27 = math.exp %26 : vector<16x256xf32>
    %cst_18 = arith.constant dense<0.000000e+00> : vector<16xf32>
    %28 = vector.multi_reduction <add>, %27, %cst_18 [1] : vector<16x256xf32> to vector<16xf32>
    %29 = vector.shape_cast %28 : vector<16xf32> to vector<16x1xf32>
    %30 = tpu.reciprocal %29 {approx = true} : vector<16x1xf32> -> vector<16x1xf32>
    %31 = arith.mulf %29, %30 : vector<16x1xf32>
    %cst_19 = arith.constant 2.000000e+00 : f32
    %32 = vector.broadcast %cst_19 : f32 to vector<16x1xf32>
    %33 = arith.subf %32, %31 : vector<16x1xf32>
    %34 = arith.mulf %30, %33 : vector<16x1xf32>
    %35 = vector.broadcast %34 : vector<16x1xf32> to vector<16x256xf32>
    %36 = arith.mulf %27, %35 : vector<16x256xf32>
    %c0_20 = arith.constant 0 : index
    %c0_21 = arith.constant 0 : index
    %37 = vector.load %arg8[%c0_20, %c0_21] : memref<16x256xf32, #tpu.memory_space<vmem>>, vector<16x256xf32>
    tpu.vector_store %arg8[%c0_20, %c0_21], %36 {strides = array<i32>} : memref<16x256xf32, #tpu.memory_space<vmem>>, vector<16x256xf32>,
    return
  }
  func.func @transform_0(%arg0: i32) -> (i32, i32) {
    %c0_i32 = arith.constant 0 : i32
    %c0_i32_0 = arith.constant 0 : i32
    return %arg0, %c0_i32 : i32, i32
  }
  func.func @transform_1(%arg0: i32) -> (i32, i32) {
    %c0_i32 = arith.constant 0 : i32
    %c0_i32_0 = arith.constant 0 : i32
    %c0_i32_1 = arith.constant 0 : i32
    return %c0_i32, %c0_i32_0 : i32, i32
  }
  func.func @transform_2(%arg0: i32) -> (i32, i32) {
    %c0_i32 = arith.constant 0 : i32
    %c0_i32_0 = arith.constant 0 : i32
    %c0_i32_1 = arith.constant 0 : i32
    return %c0_i32, %c0_i32_0 : i32, i32
  }
  func.func @transform_3(%arg0: i32) -> (i32, i32) {
    %c0_i32 = arith.constant 0 : i32
    %c0_i32_0 = arith.constant 0 : i32
    %c0_i32_1 = arith.constant 0 : i32
    return %c0_i32, %c0_i32_0 : i32, i32
  }
  func.func @transform_4(%arg0: i32) -> (i32, i32) {
    %c0_i32 = arith.constant 0 : i32
    %c0_i32_0 = arith.constant 0 : i32
    %c0_i32_1 = arith.constant 0 : i32
    return %c0_i32, %c0_i32_0 : i32, i32
  }
  func.func @transform_5(%arg0: i32) -> (i32, i32) {
    %c0_i32 = arith.constant 0 : i32
    %c0_i32_0 = arith.constant 0 : i32
    %c0_i32_1 = arith.constant 0 : i32
    return %c0_i32, %c0_i32_0 : i32, i32
  }
  func.func @transform_6(%arg0: i32) -> (i32, i32) {
    %c0_i32 = arith.constant 0 : i32
    %c0_i32_0 = arith.constant 0 : i32
    %c0_i32_1 = arith.constant 0 : i32
    return %c0_i32, %c0_i32_0 : i32, i32
  }
  func.func @transform_7(%arg0: i32) -> (i32, i32) {
    %c0_i32 = arith.constant 0 : i32
    %c0_i32_0 = arith.constant 0 : i32
    return %arg0, %c0_i32 : i32, i32
  }
}

</mosaic_0001>

<bundles_post_ra>
// kernel: _tac_policy_jit.1
= control target key start
LH: loop header
LB: loop body
LE: loop exit
PB: predicated region body
PF: predicated region fallthrough
CT: control target
= control target key end

     0   :  { %12 = vsyncpa [#allocation3], 0  ;;  %s5131_s0 = inlined_call_operand.vmem [shape: f32[32,256], index: 0, kind: input, shape index: {}]   ;;  %s5132_s1 = inlined_call_operand.hbm [shape: bf16[256,512], index: 1, kind: input, shape index: {}]   ;;  %s5133_s2 = inlined_call_operand.vmem [shape: f32[1,512], index: 2, kind: input, shape index: {}]   ;;  %s5134_s3 = inlined_call_operand.hbm [shape: bf16[512,1024], index: 3, kind: input, shape index: {}]   ;;  %s5135_s4 = inlined_call_operand.vmem [shape: f32[1,1024], index: 4, kind: input, shape index: {}]   ;;  %s5136_s5 = inlined_call_operand.hbm [shape: bf16[1024,256], index: 5, kind: input, shape index: {}]   ;;  %s5137_s6 = inlined_call_operand.vmem [shape: f32[1,256], index: 6, kind: input, shape index: {}]   ;;  %s5138_s7 = inlined_call_operand.vmem [shape: f32[32,256], index: 7, kind: output, shape index: {}]  }
   0x1   :  { %13 = vsyncpa [#allocation5], 0  ;;  %s4879_s24 = smov 0  }
   0x2 LB: > { %s4830_s25 = smov [#allocation4]   ;;  %s3868_s27 = sadd.s32 4294967295, %s4828_s24   ;;  %s4828_s24 = sphi %s4879_s24, %s19_s24  }
   0x3   : > { %s230_s26 = sshll.u32 %s4830_s25, 4  ;;  %p3870_p0 = scmp.ge.s32.totalorder %s4828_s24, 1  ;;  %s4893_s26 = int_to_ptr.vmem [resolvable:$true] %s230_s26 }
   0x4   : > { %p202_p1 = scmp.lt.s32.totalorder %s4828_s24, 3  ;;  %p4889_p2 = scmp.eq.s32.totalorder %s3868_s27, 0 }
   0x5   : > { %s4831_s30 = smov [#allocation2]   ;;  %s4832_s10 = smov [#allocation6]  }
   0x6   : > { %s5142_s28 = scalar_select %p4889_p2, 1, 0 }
   0x7   : > { %p4895_p3 = pnand %p3870_p0, %p202_p1  ;;  %s214_s8 = sshll.u32 %s4831_s30, 4  ;;  %s4901_s8 = int_to_ptr.vmem [resolvable:$true] %s214_s8 }
   0x8   : > { %s4909_s11 = sshll.u32 %s4832_s10, 4  ;;  %s4730_s14 = scalar_lea.hbm %s5134_s3, 32768  ;;  %s247_s11 = int_to_ptr.vmem [resolvable:$true] %s4909_s11 }
   0x9   : > { %s5143_s29 = scalar_select %p4895_p3, 1, 0 }
   0xa   : > { %p4397_p4 = pneg %p4895_p3  ;;  %p4731_p6 = scmp.ne.s32.totalorder %s5134_s3, %s4730_s14 }
   0xb   : > { %p4737_p10 = scmp.lt.u32.totalorder %s4730_s14, %s5134_s3 }
   0xc   : > { %p4905_p5 = pnand %p4889_p2, %p4397_p4 }
   0xe   : > { %p4919_p7 = pneg %p4905_p5 }
  0x10   : > { %p4733_p8 = pnand %p4919_p7, %p4731_p6 }
  0x12   : > { %p4734_p9 = pneg %p4733_p8 }
  0x14   : > { %p4739_p11 = pnand %p4737_p10, %p4734_p9 }
  0x16   : > { %4742 = shalt.err (!%p4739_p11)
}
  0x17   : > { %s4743_s20 = scalar_lea.vmem %s4893_s26, 32768  ;;  %p4751_p1 = scmp.lt.s32.totalorder %s4893_s26, %s4893_s26 }
  0x18   : > { %p4744_p12 = scmp.ne.s32.totalorder %s4893_s26, %s4743_s20  ;;  %p4752_p4 = scmp.lt.s32.totalorder %s4743_s20, %s4743_s20 }
  0x1a   : > { %p4746_p13 = pnand %p4744_p12, %p4919_p7  ;;  %p4753_p6 = por %p4752_p4, %p4751_p1 }
  0x1c   : > { %p4747_p0 = pneg %p4746_p13 }
  0x1e   : > { %p4754_p8 = pnand %p4753_p6, %p4747_p0 }
  0x20   : > { %4757 = shalt.err (!%p4754_p8)
}
  0x21   : > { %s4833_s21 = smov 512   ;;  %s4834_s22 = smov 32  }
  0x22   : > { %4403 = dma.hbm_to_vmem [thread:$0]  (!%p4905_p5), %s5134_s3, 32768, %s4893_s26, [#allocation5], %s4833_s21, %s4833_s21, %s4834_s22  }
  0x23   : > { %s4758_s12 = scalar_lea.hbm %s5132_s1, 8192 }
  0x24   : > { %p4759_p9 = scmp.ne.s32.totalorder %s5132_s1, %s4758_s12  ;;  %p4765_p12 = scmp.lt.u32.totalorder %s4758_s12, %s5132_s1 }
  0x26   : > { %p4761_p10 = pnand %p4759_p9, %p4919_p7 }
  0x28   : > { %p4762_p11 = pneg %p4761_p10 }
  0x2a   : > { %p4767_p13 = pnand %p4765_p12, %p4762_p11 }
  0x2c   : > { %4770 = shalt.err (!%p4767_p13)
}
  0x2d   : > { %s4771_s26 = scalar_lea.vmem %s4901_s8, 8192  ;;  %p4779_p6 = scmp.lt.s32.totalorder %s4901_s8, %s4901_s8 }
  0x2e   : > { %p4772_p0 = scmp.ne.s32.totalorder %s4901_s8, %s4771_s26  ;;  %p4780_p8 = scmp.lt.s32.totalorder %s4771_s26, %s4771_s26 }
  0x30   : > { %p4774_p1 = pnand %p4772_p0, %p4919_p7  ;;  %p4781_p9 = por %p4780_p8, %p4779_p6 }
  0x32   : > { %p4775_p4 = pneg %p4774_p1 }
  0x34   : > { %p4782_p10 = pnand %p4781_p9, %p4775_p4 }
  0x36   : > { %4785 = shalt.err (!%p4782_p10)
}
  0x37   : > { %s4835_s18 = smov 256   ;;  %s4836_s19 = smov 16  }
  0x38   : > { %4400 = dma.hbm_to_vmem [thread:$0]  (!%p4905_p5), %s5132_s1, 8192, %s4901_s8, [#allocation3], %s4835_s18, %s4835_s18, %s4836_s19  }
  0x39   : > { %s4786_s25 = scalar_lea.hbm %s5136_s5, 16384 }
  0x3a   : > { %p4787_p11 = scmp.ne.s32.totalorder %s5136_s5, %s4786_s25  ;;  %p4793_p0 = scmp.lt.u32.totalorder %s4786_s25, %s5136_s5 }
  0x3c   : > { %p4789_p12 = pnand %p4787_p11, %p4919_p7 }
  0x3e   : > { %p4790_p13 = pneg %p4789_p12 }
  0x40   : > { %p4795_p1 = pnand %p4793_p0, %p4790_p13 }
  0x42   : > { %4798 = shalt.err (!%p4795_p1)
}
  0x43   : > { %s4799_s14 = scalar_lea.vmem %s247_s11, 16384  ;;  %p4807_p9 = scmp.lt.s32.totalorder %s247_s11, %s247_s11 }
  0x44   : > { %p4800_p4 = scmp.ne.s32.totalorder %s247_s11, %s4799_s14  ;;  %p4808_p10 = scmp.lt.s32.totalorder %s4799_s14, %s4799_s14 }
  0x46   : > { %p4802_p6 = pnand %p4800_p4, %p4919_p7  ;;  %p4809_p2 = por %p4808_p10, %p4807_p9 }
  0x48   : > { %p4803_p8 = pneg %p4802_p6 }
  0x4a   : > { %p4810_p3 = pnand %p4809_p2, %p4803_p8 }
  0x4c   : > { %4813 = shalt.err (!%p4810_p3)
}
  0x4d   : > { %s4837_s8 = smov 128   ;;  %s4838_s15 = smov 8  }
  0x4e   : > { %4406 = dma.hbm_to_vmem [thread:$0]  (!%p4905_p5), %s5136_s5, 16384, %s247_s11, [#allocation5], %s4837_s8, %s4837_s8, %s4838_s15  }
  0x4f   : > { %p5146_p11 = scmp.ne.s32.totalorder %s5143_s29, 0 }
  0x50   : > { %p5147_p12 = scmp.ne.s32.totalorder (!%p5146_p11), %s5142_s28, 0 }
  0x51   : > { %275 = sbr.rel (%p5146_p11) target bundleno = 1400 (0x578), region = 48 }
  0x58   : > { %4819 = dma.done.wait (%p5147_p12), [#allocation3], 8192  }
  0x59   : > { %4821 = vsyncadd (%p5147_p12), [#allocation3], 4294959104 }
  0x5a   : > { %4823 = dma.done.wait (%p5147_p12), [#allocation5], 49152  }
  0x5b   : > { %4825 = vsyncadd (%p5147_p12), [#allocation5], 4294918144  ;;  %v4430_v0 = vld [vmem:[#allocation2 + $0x4] ss:$16 sps:$4 sm:$0xff]   ;;  %v4432_v1 = vld [vmem:[#allocation2] ss:$16 sps:$4 sm:$0xff]  }
  0x5c   : > { %743 = vmatprep.subr.bf16.mxu1 %v4430_v0  ;;  %v4433_v2 = vld [vmem:[#allocation2 + $0x24] ss:$16 sps:$4 sm:$0xff]   ;;  %v4435_v3 = vld [vmem:[#allocation2 + $0x20] ss:$16 sps:$4 sm:$0xff]   ;;  %s3879_s29 = sshll.u32 %s3868_s27, 1 }
  0x5d   : > { %744 = vmatpush1.bf16.msra.mxu1 %v4432_v1  ;;  %v4436_v4 = vld [vmem:[#allocation2 + $0x44] ss:$16 sps:$4 sm:$0xff]   ;;  %v4438_v5 = vld [vmem:[#allocation2 + $0x40] ss:$16 sps:$4 sm:$0xff]   ;;  %p318_p2 = scmp.lt.s32.totalorder %s3879_s29, 3 }
  0x5e   : > { %745 = vmatprep.subr.bf16.mxu1 %v4433_v2  ;;  %v4439_v6 = vld [vmem:[#allocation2 + $0x64] ss:$16 sps:$4 sm:$0xff]   ;;  %v4441_v7 = vld [vmem:[#allocation2 + $0x60] ss:$16 sps:$4 sm:$0xff]   ;;  %v4480_v37 = vld [vmem:[#allocation2 + $0xc] ss:$16 sps:$4 sm:$0xff]  }
  0x5f   : > { %s5149_s29 = smov (!%p318_p2, %s3879_s29), 3  ;;  %v4442_v8 = vld [vmem:[#allocation2 + $0x84] ss:$16 sps:$4 sm:$0xff]   ;;  %v4444_v9 = vld [vmem:[#allocation2 + $0x80] ss:$16 sps:$4 sm:$0xff]  }
  0x60   : > { %s4335_s28 = sshll.u32 %s5149_s29, 4  ;;  %v4445_v10 = vld [vmem:[#allocation2 + $0xa4] ss:$16 sps:$4 sm:$0xff]   ;;  %v4447_v11 = vld [vmem:[#allocation2 + $0xa0] ss:$16 sps:$4 sm:$0xff]  }
  0x61   : > { %746 = vmatpush1.bf16.msra.mxu1 %v4435_v3  ;;  %s5002_s11 = scalar_lea.vmem %s5131_s0, %s4335_s28  ;;  %v4448_v12 = vld [vmem:[#allocation2 + $0xc4] ss:$16 sps:$4 sm:$0xff]   ;;  %v4450_v16 = vld [vmem:[#allocation2 + $0xc0] ss:$16 sps:$4 sm:$0xff]   ;;  %v4478_v38 = vld [vmem:[#allocation2 + $0x8] ss:$16 sps:$4 sm:$0xff]   ;;  %s329_s30 = scalar_lea.vmem %s5138_s7, %s4335_s28 }
  0x62   : > { %747 = vmatprep.subr.bf16.mxu1 %v4436_v4  ;;  %v332_v13 = vld [vmem:[%s5002_s11 + $0x8] sm:$0xff]  ;;  %v334_v14 = vld [vmem:[%s5002_s11 + $0x18] sm:$0xff]  ;;  %v4451_v17 = vld [vmem:[#allocation2 + $0xe4] ss:$16 sps:$4 sm:$0xff]  }
  0x63   : > { %v336_v15 = vpack.c.bf16 %v334_v14, %v332_v13  ;;  %v4453_v18 = vld [vmem:[#allocation2 + $0xe0] ss:$16 sps:$4 sm:$0xff]   ;;  %v4454_v19 = vld [vmem:[#allocation2 + $0x104] ss:$16 sps:$4 sm:$0xff]   ;;  %v4483_v40 = vld [vmem:[#allocation2 + $0x2c] ss:$16 sps:$4 sm:$0xff]  }
  0x64   : > { %v4456_v20 = vld [vmem:[#allocation2 + $0x100] ss:$16 sps:$4 sm:$0xff]   ;;  %v4457_v21 = vld [vmem:[#allocation2 + $0x124] ss:$16 sps:$4 sm:$0xff]   ;;  %v4481_v41 = vld [vmem:[#allocation2 + $0x28] ss:$16 sps:$4 sm:$0xff]  }
  0x65   : > { %748 = vmatpush1.bf16.msra.mxu1 %v4438_v5  ;;  %775 = vmatprep.mubr.bf16.mxu1 %v336_v15  ;;  %v4459_v22 = vld [vmem:[#allocation2 + $0x120] ss:$16 sps:$4 sm:$0xff]   ;;  %v4460_v23 = vld [vmem:[#allocation2 + $0x144] ss:$16 sps:$4 sm:$0xff]   ;;  %v4486_v42 = vld [vmem:[#allocation2 + $0x4c] ss:$16 sps:$4 sm:$0xff]  }
  0x66   : > { %749 = vmatprep.subr.bf16.mxu1 %v4439_v6  ;;  %v4462_v24 = vld [vmem:[#allocation2 + $0x140] ss:$16 sps:$4 sm:$0xff]   ;;  %v4463_v25 = vld [vmem:[#allocation2 + $0x164] ss:$16 sps:$4 sm:$0xff]   ;;  %v4484_v43 = vld [vmem:[#allocation2 + $0x48] ss:$16 sps:$4 sm:$0xff]  }
  0x67   : > { %v4465_v26 = vld [vmem:[#allocation2 + $0x160] ss:$16 sps:$4 sm:$0xff]   ;;  %v4466_v27 = vld [vmem:[#allocation2 + $0x184] ss:$16 sps:$4 sm:$0xff]   ;;  %v4489_v44 = vld [vmem:[#allocation2 + $0x6c] ss:$16 sps:$4 sm:$0xff]  }
  0x68   : > { %v4468_v28 = vld [vmem:[#allocation2 + $0x180] ss:$16 sps:$4 sm:$0xff]   ;;  %v4469_v29 = vld [vmem:[#allocation2 + $0x1a4] ss:$16 sps:$4 sm:$0xff]   ;;  %v4487_v45 = vld [vmem:[#allocation2 + $0x68] ss:$16 sps:$4 sm:$0xff]  }
  0x69   : > { %750 = vmatpush1.bf16.msra.mxu1 %v4441_v7  ;;  %v4471_v30 = vld [vmem:[#allocation2 + $0x1a0] ss:$16 sps:$4 sm:$0xff]   ;;  %v4472_v31 = vld [vmem:[#allocation2 + $0x1c4] ss:$16 sps:$4 sm:$0xff]   ;;  %v4492_v46 = vld [vmem:[#allocation2 + $0x8c] ss:$16 sps:$4 sm:$0xff]  }
  0x6a   : > { %751 = vmatprep.subr.bf16.mxu1 %v4442_v8  ;;  %v4474_v32 = vld [vmem:[#allocation2 + $0x1c0] ss:$16 sps:$4 sm:$0xff]   ;;  %v4475_v33 = vld [vmem:[#allocation2 + $0x1e4] ss:$16 sps:$4 sm:$0xff]   ;;  %v4490_v47 = vld [vmem:[#allocation2 + $0x88] ss:$16 sps:$4 sm:$0xff]  }
  0x6b   : > { %v4477_v34 = vld [vmem:[#allocation2 + $0x1e0] ss:$16 sps:$4 sm:$0xff]   ;;  %v4495_v48 = vld [vmem:[#allocation2 + $0xac] ss:$16 sps:$4 sm:$0xff]   ;;  %v4493_v49 = vld [vmem:[#allocation2 + $0xa8] ss:$16 sps:$4 sm:$0xff]  }
  0x6c   : > { %v331_v35 = vld [vmem:[%s5002_s11] sm:$0xff]  ;;  %v333_v36 = vld [vmem:[%s5002_s11 + $0x10] sm:$0xff]  ;;  %v4498_v50 = vld [vmem:[#allocation2 + $0xcc] ss:$16 sps:$4 sm:$0xff]  }
  0x6d   : > { %752 = vmatpush1.bf16.msra.mxu1 %v4444_v9  ;;  %v5008_v39 = vpack.c.bf16 %v333_v36, %v331_v35  ;;  %v4496_v51 = vld [vmem:[#allocation2 + $0xc8] ss:$16 sps:$4 sm:$0xff]   ;;  %v4501_v52 = vld [vmem:[#allocation2 + $0xec] ss:$16 sps:$4 sm:$0xff]   ;;  %v841_v5 = vld [vmem:[#allocation4] sm:$0xff] }
  0x6e   : > { %753 = vmatprep.subr.bf16.mxu1 %v4445_v10  ;;  %v4499_v53 = vld [vmem:[#allocation2 + $0xe8] ss:$16 sps:$4 sm:$0xff]   ;;  %v4504_v54 = vld [vmem:[#allocation2 + $0x10c] ss:$16 sps:$4 sm:$0xff]   ;;  %v845_v6 = vld [vmem:[#allocation4 + $0x20] sm:$0xff] }
  0x6f   : > { %v4502_v55 = vld [vmem:[#allocation2 + $0x108] ss:$16 sps:$4 sm:$0xff]   ;;  %v4507_v56 = vld [vmem:[#allocation2 + $0x12c] ss:$16 sps:$4 sm:$0xff]   ;;  %v3950_v8 = vcombine.high %v841_v5, %v845_v6  ;;  %v849_v9 = vld [vmem:[#allocation4 + $0x40] sm:$0xff] }
  0x70   : > { %v4505_v57 = vld [vmem:[#allocation2 + $0x128] ss:$16 sps:$4 sm:$0xff]   ;;  %v4510_v58 = vld [vmem:[#allocation2 + $0x14c] ss:$16 sps:$4 sm:$0xff]   ;;  %v853_v10 = vld [vmem:[#allocation4 + $0x60] sm:$0xff] }
  0x71   : > { %754 = vmatpush1.bf16.msra.mxu1 %v4447_v11  ;;  %v4508_v59 = vld [vmem:[#allocation2 + $0x148] ss:$16 sps:$4 sm:$0xff]   ;;  %v4513_v60 = vld [vmem:[#allocation2 + $0x16c] ss:$16 sps:$4 sm:$0xff]   ;;  %v3949_v11 = vcombine.low %v841_v5, %v845_v6  ;;  %v857_v13 = vld [vmem:[#allocation4 + $0x80] sm:$0xff] }
  0x72   : > { %755 = vmatprep.subr.bf16.mxu1 %v4448_v12  ;;  %v4511_v61 = vld [vmem:[#allocation2 + $0x168] ss:$16 sps:$4 sm:$0xff]   ;;  %v4516_v62 = vld [vmem:[#allocation2 + $0x18c] ss:$16 sps:$4 sm:$0xff]   ;;  %v3958_v12 = vcombine.high %v849_v9, %v853_v10  ;;  %v861_v14 = vld [vmem:[#allocation4 + $0xa0] sm:$0xff] }
  0x73   : > { %v4514_v63 = vld [vmem:[#allocation2 + $0x188] ss:$16 sps:$4 sm:$0xff]   ;;  %v4519_v0 = vld [vmem:[#allocation2 + $0x1ac] ss:$16 sps:$4 sm:$0xff]   ;;  %v941_v5 = vld [vmem:[#allocation4 + $0x320] sm:$0xff] }
  0x74   : > { %v4517_v1 = vld [vmem:[#allocation2 + $0x1a8] ss:$16 sps:$4 sm:$0xff]   ;;  %v4522_v2 = vld [vmem:[#allocation2 + $0x1cc] ss:$16 sps:$4 sm:$0xff]   ;;  %v993_v6 = vld [vmem:[#allocation4 + $0x4c0] sm:$0xff] }
  0x75   : > { %756 = vmatpush1.bf16.msra.mxu1 %v4450_v16  ;;  %v4520_v3 = vld [vmem:[#allocation2 + $0x1c8] ss:$16 sps:$4 sm:$0xff]   ;;  %v4525_v4 = vld [vmem:[#allocation2 + $0x1ec] ss:$16 sps:$4 sm:$0xff]   ;;  %v3966_v16 = vcombine.high %v857_v13, %v861_v14 }
  0x76   : > { %757 = vmatprep.subr.bf16.mxu1 %v4451_v17  ;;  %v4523_v7 = vld [vmem:[#allocation2 + $0x1e8] ss:$16 sps:$4 sm:$0xff]   ;;  %v865_v17 = vld [vmem:[#allocation4 + $0xc0] sm:$0xff] }
  0x79   : > { %758 = vmatpush1.bf16.msra.mxu1 %v4453_v18  ;;  %v869_v18 = vld [vmem:[#allocation4 + $0xe0] sm:$0xff] }
  0x7a   : > { %759 = vmatprep.subr.bf16.mxu1 %v4454_v19  ;;  %v3965_v19 = vcombine.low %v857_v13, %v861_v14  ;;  %v949_v13 = vld [vmem:[#allocation4 + $0x360] sm:$0xff] }
  0x7b   : > { %v1001_v14 = vld [vmem:[#allocation4 + $0x500] sm:$0xff] }
  0x7d   : > { %760 = vmatpush1.bf16.msra.mxu1 %v4456_v20  ;;  %v3974_v20 = vcombine.high %v865_v17, %v869_v18 }
  0x7e   : > { %761 = vmatprep.subr.bf16.mxu1 %v4457_v21  ;;  %v873_v21 = vld [vmem:[#allocation4 + $0x100] sm:$0xff] }
  0x81   : > { %762 = vmatpush1.bf16.msra.mxu1 %v4459_v22  ;;  %v877_v22 = vld [vmem:[#allocation4 + $0x120] sm:$0xff] }
  0x82   : > { %763 = vmatprep.subr.bf16.mxu1 %v4460_v23  ;;  %v3973_v23 = vcombine.low %v865_v17, %v869_v18 }
  0x85   : > { %764 = vmatpush1.bf16.msra.mxu1 %v4462_v24  ;;  %v3982_v24 = vcombine.high %v873_v21, %v877_v22 }
  0x86   : > { %765 = vmatprep.subr.bf16.mxu1 %v4463_v25  ;;  %v881_v25 = vld [vmem:[#allocation4 + $0x140] sm:$0xff] }
  0x89   : > { %766 = vmatpush1.bf16.msra.mxu1 %v4465_v26  ;;  %v885_v26 = vld [vmem:[#allocation4 + $0x160] sm:$0xff] }
  0x8a   : > { %767 = vmatprep.subr.bf16.mxu1 %v4466_v27  ;;  %v3981_v27 = vcombine.low %v873_v21, %v877_v22  ;;  %v957_v21 = vld [vmem:[#allocation4 + $0x3a0] sm:$0xff] }
  0x8b   : > { %v1009_v22 = vld [vmem:[#allocation4 + $0x540] sm:$0xff] }
  0x8d   : > { %768 = vmatpush1.bf16.msra.mxu1 %v4468_v28  ;;  %v3990_v28 = vcombine.high %v881_v25, %v885_v26 }
  0x8e   : > { %769 = vmatprep.subr.bf16.mxu1 %v4469_v29  ;;  %v889_v29 = vld [vmem:[#allocation4 + $0x180] sm:$0xff] }
  0x91   : > { %770 = vmatpush1.bf16.msra.mxu1 %v4471_v30  ;;  %v893_v30 = vld [vmem:[#allocation4 + $0x1a0] sm:$0xff] }
  0x92   : > { %771 = vmatprep.subr.bf16.mxu1 %v4472_v31  ;;  %v3989_v31 = vcombine.low %v881_v25, %v885_v26  ;;  %v3997_v35 = vcombine.low %v889_v29, %v893_v30 }
  0x95   : > { %772 = vmatpush1.bf16.msra.mxu1 %v4474_v32  ;;  %v3998_v32 = vcombine.high %v889_v29, %v893_v30  ;;  %v965_v29 = vld [vmem:[#allocation4 + $0x3e0] sm:$0xff] }
  0x96   : > { %773 = vmatprep.subr.bf16.mxu1 %v4475_v33  ;;  %v897_v33 = vld [vmem:[#allocation4 + $0x1c0] sm:$0xff] }
  0x97   : > { %v1017_v30 = vld [vmem:[#allocation4 + $0x580] sm:$0xff] }
  0x99   : > { %774 = vmatpush1.bf16.msra.mxu1 %v4477_v34  ;;  %v901_v34 = vld [vmem:[#allocation4 + $0x1e0] sm:$0xff] }
  0x9a   : > { %786 = vmatprep.subr.bf16.mxu1 %v4480_v37  ;;  %v4006_v36 = vcombine.high %v897_v33, %v901_v34  ;;  %v905_v37 = vld [vmem:[#allocation4 + $0x200] sm:$0xff] }
  0x9c   : > { %776 = vmatmul.mubr.bf16.vlgmr.msra.gmra.mrb[0].mxu1 %v5008_v39 }
  0x9d   : > { %787 = vmatpush1.bf16.msra.mxu1 %v4478_v38  ;;  %818 = vmatprep.mubr.bf16.mxu1 %v336_v15  ;;  %v3957_v15 = vcombine.low %v849_v9, %v853_v10  ;;  %v909_v38 = vld [vmem:[#allocation4 + $0x220] sm:$0xff] }
  0x9e   : > { %788 = vmatprep.subr.bf16.mxu1 %v4483_v40  ;;  %v4014_v40 = vcombine.high %v905_v37, %v909_v38 }
  0xa1   : > { %789 = vmatpush1.bf16.msra.mxu1 %v4481_v41  ;;  %v969_v41 = vld [vmem:[#allocation4 + $0x400] sm:$0xff] }
  0xa2   : > { %790 = vmatprep.subr.bf16.mxu1 %v4486_v42  ;;  %v973_v42 = vld [vmem:[#allocation4 + $0x420] sm:$0xff] }
  0xa5   : > { %791 = vmatpush1.bf16.msra.mxu1 %v4484_v43  ;;  %v5012_v43 = vld [vmem:[#allocation4 + $0x8] sm:$0xff] }
  0xa6   : > { %792 = vmatprep.subr.bf16.mxu1 %v4489_v44  ;;  %v913_v44 = vld [vmem:[#allocation4 + $0x240] sm:$0xff] }
  0xa9   : > { %793 = vmatpush1.bf16.msra.mxu1 %v4487_v45  ;;  %v917_v45 = vld [vmem:[#allocation4 + $0x260] sm:$0xff] }
  0xaa   : > { %794 = vmatprep.subr.bf16.mxu1 %v4492_v46  ;;  %v4078_v46 = vcombine.high %v969_v41, %v973_v42 }
  0xac   : > { %2462 = vmatprep.subr.bf16.mxu0 %v4078_v46 }
  0xad   : > { %795 = vmatpush1.bf16.msra.mxu1 %v4490_v47  ;;  %v5014_v47 = vld [vmem:[#allocation4 + $0x28] sm:$0xff] }
  0xae   : > { %796 = vmatprep.subr.bf16.mxu1 %v4495_v48  ;;  %v3951_v48 = vcombine.low %v5012_v43, %v5014_v47 }
  0xb1   : > { %797 = vmatpush1.bf16.msra.mxu1 %v4493_v49  ;;  %v4077_v49 = vcombine.low %v969_v41, %v973_v42  ;;  %v3952_v41 = vcombine.high %v5012_v43, %v5014_v47  ;;  %v1033_v42 = vld [vmem:[#allocation4 + $0x600] sm:$0xff]  ;;  %v886_v43 = vld [vmem:[#allocation4 + $0x168] sm:$0xff] }
  0xb2   : > { %798 = vmatprep.subr.bf16.mxu1 %v4498_v50  ;;  %v4013_v50 = vcombine.low %v905_v37, %v909_v38  ;;  %v1029_v37 = vld [vmem:[#allocation4 + $0x5e0] sm:$0xff] }
  0xb3   : > { %2463 = vmatpush1.bf16.msra.mxu0 %v4077_v49  ;;  %v1041_v49 = vld [vmem:[#allocation4 + $0x640] sm:$0xff] }
  0xb5   : > { %799 = vmatpush1.bf16.msra.mxu1 %v4496_v51  ;;  %v4022_v51 = vcombine.high %v913_v44, %v917_v45 }
  0xb6   : > { %800 = vmatprep.subr.bf16.mxu1 %v4501_v52  ;;  %v921_v52 = vld [vmem:[#allocation4 + $0x280] sm:$0xff] }
  0xb9   : > { %801 = vmatpush1.bf16.msra.mxu1 %v4499_v53  ;;  %v925_v53 = vld [vmem:[#allocation4 + $0x2a0] sm:$0xff] }
  0xba   : > { %802 = vmatprep.subr.bf16.mxu1 %v4504_v54  ;;  %v977_v54 = vld [vmem:[#allocation4 + $0x440] sm:$0xff] }
  0xbd   : > { %803 = vmatpush1.bf16.msra.mxu1 %v4502_v55  ;;  %v981_v55 = vld [vmem:[#allocation4 + $0x460] sm:$0xff] }
  0xbe   : > { %804 = vmatprep.subr.bf16.mxu1 %v4507_v56  ;;  %v4086_v56 = vcombine.high %v977_v54, %v981_v55 }
  0xc0   : > { %2464 = vmatprep.subr.bf16.mxu0 %v4086_v56 }
  0xc1   : > { %805 = vmatpush1.bf16.msra.mxu1 %v4505_v57  ;;  %v4085_v57 = vcombine.low %v977_v54, %v981_v55  ;;  %v1053_v54 = vld [vmem:[#allocation4 + $0x6a0] sm:$0xff] }
  0xc2   : > { %806 = vmatprep.subr.bf16.mxu1 %v4510_v58  ;;  %v4021_v58 = vcombine.low %v913_v44, %v917_v45  ;;  %v1037_v44 = vld [vmem:[#allocation4 + $0x620] sm:$0xff] }
  0xc3   : > { %2465 = vmatpush1.bf16.msra.mxu0 %v4085_v57  ;;  %v4142_v45 = vcombine.high %v1033_v42, %v1037_v44  ;;  %v4141_v46 = vcombine.low %v1033_v42, %v1037_v44  ;;  %v1057_v57 = vld [vmem:[#allocation4 + $0x6c0] sm:$0xff]  ;;  %v862_v42 = vld [vmem:[#allocation4 + $0xa8] sm:$0xff] }
  0xc5   : > { %807 = vmatpush1.bf16.msra.mxu1 %v4508_v59  ;;  %v4030_v59 = vcombine.high %v921_v52, %v925_v53 }
  0xc6   : > { %808 = vmatprep.subr.bf16.mxu1 %v4513_v60  ;;  %v929_v60 = vld [vmem:[#allocation4 + $0x2c0] sm:$0xff] }
  0xc9   : > { %809 = vmatpush1.bf16.msra.mxu1 %v4511_v61  ;;  %v933_v61 = vld [vmem:[#allocation4 + $0x2e0] sm:$0xff] }
  0xca   : > { %810 = vmatprep.subr.bf16.mxu1 %v4516_v62  ;;  %v985_v62 = vld [vmem:[#allocation4 + $0x480] sm:$0xff]  ;;  %v4037_v10 = vcombine.low %v929_v60, %v933_v61 }
  0xcd   : > { %811 = vmatpush1.bf16.msra.mxu1 %v4514_v63  ;;  %v989_v63 = vld [vmem:[#allocation4 + $0x4a0] sm:$0xff] }
  0xce   : > { %812 = vmatprep.subr.bf16.mxu1 %v4519_v0  ;;  %v4094_v0 = vcombine.high %v985_v62, %v989_v63 }
  0xd0   : > { %2466 = vmatprep.subr.bf16.mxu0 %v4094_v0 }
  0xd1   : > { %813 = vmatpush1.bf16.msra.mxu1 %v4517_v1  ;;  %v4093_v1 = vcombine.low %v985_v62, %v989_v63  ;;  %v1069_v62 = vld [vmem:[#allocation4 + $0x720] sm:$0xff] }
  0xd2   : > { %814 = vmatprep.subr.bf16.mxu1 %v4522_v2  ;;  %v4029_v2 = vcombine.low %v921_v52, %v925_v53  ;;  %v1049_v53 = vld [vmem:[#allocation4 + $0x680] sm:$0xff] }
  0xd3   : > { %2467 = vmatpush1.bf16.msra.mxu0 %v4093_v1  ;;  %v4158_v55 = vcombine.high %v1049_v53, %v1053_v54  ;;  %v4157_v56 = vcombine.low %v1049_v53, %v1053_v54  ;;  %v1073_v1 = vld [vmem:[#allocation4 + $0x740] sm:$0xff]  ;;  %v878_v53 = vld [vmem:[#allocation4 + $0x128] sm:$0xff] }
  0xd5   : > { %815 = vmatpush1.bf16.msra.mxu1 %v4520_v3  ;;  %v4038_v3 = vcombine.high %v929_v60, %v933_v61  ;;  %v1065_v61 = vld [vmem:[#allocation4 + $0x700] sm:$0xff] }
  0xd6   : > { %816 = vmatprep.subr.bf16.mxu1 %v4525_v4  ;;  %v937_v4 = vld [vmem:[#allocation4 + $0x300] sm:$0xff]  ;;  %v4174_v63 = vcombine.high %v1065_v61, %v1069_v62  ;;  %v4173_v0 = vcombine.low %v1065_v61, %v1069_v62  ;;  %v898_v61 = vld [vmem:[#allocation4 + $0x1c8] sm:$0xff] }
  0xd7   : > { %v4045_v18 = vcombine.low %v937_v4, %v941_v5  ;;  %v902_v62 = vld [vmem:[#allocation4 + $0x1e8] sm:$0xff] }
  0xd9   : > { %817 = vmatpush1.bf16.msra.mxu1 %v4523_v7  ;;  %v997_v7 = vld [vmem:[#allocation4 + $0x4e0] sm:$0xff] }
  0xda   : > { %2419 = vmatprep.subr.bf16.mxu1 %v3950_v8  ;;  %v4102_v8 = vcombine.high %v993_v6, %v997_v7  ;;  %v4101_v9 = vcombine.low %v993_v6, %v997_v7  ;;  %v1085_v6 = vld [vmem:[#allocation4 + $0x7a0] sm:$0xff] }
  0xdc   : > { %819 = vmatmul.mubr.bf16.vlgmr.msra.gmra.mrb[4].mxu1 %v5008_v39  ;;  %v4005_v39 = vcombine.low %v897_v33, %v901_v34  ;;  %2468 = vmatprep.subr.bf16.mxu0 %v4102_v8 }
  0xdd   : > { %2420 = vmatpush1.bf16.msra.mxu1 %v3949_v11  ;;  %v4046_v11 = vcombine.high %v937_v4, %v941_v5  ;;  %2469 = vmatpush1.bf16.msra.mxu0 %v4101_v9  ;;  %v1081_v5 = vld [vmem:[#allocation4 + $0x780] sm:$0xff] }
  0xde   : > { %2421 = vmatprep.subr.bf16.mxu1 %v3958_v12  ;;  %v945_v12 = vld [vmem:[#allocation4 + $0x340] sm:$0xff]  ;;  %v4190_v7 = vcombine.high %v1081_v5, %v1085_v6  ;;  %v4189_v8 = vcombine.low %v1081_v5, %v1085_v6  ;;  %v914_v5 = vld [vmem:[#allocation4 + $0x248] sm:$0xff] }
  0xdf   : > { %v4053_v26 = vcombine.low %v945_v12, %v949_v13  ;;  %v1089_v9 = vld [vmem:[#allocation4 + $0x7c0] sm:$0xff]  ;;  %v918_v6 = vld [vmem:[#allocation4 + $0x268] sm:$0xff] }
  0xe1   : > { %2422 = vmatpush1.bf16.msra.mxu1 %v3957_v15  ;;  %v1005_v15 = vld [vmem:[#allocation4 + $0x520] sm:$0xff] }
  0xe2   : > { %2423 = vmatprep.subr.bf16.mxu1 %v3966_v16  ;;  %v4110_v16 = vcombine.high %v1001_v14, %v1005_v15  ;;  %v4109_v17 = vcombine.low %v1001_v14, %v1005_v15  ;;  %v5022_v14 = vld [vmem:[#allocation4 + $0x30] sm:$0xff] }
  0xe4   : > { %2470 = vmatprep.subr.bf16.mxu0 %v4110_v16 }
  0xe5   : > { %2424 = vmatpush1.bf16.msra.mxu1 %v3965_v19  ;;  %v4054_v19 = vcombine.high %v945_v12, %v949_v13  ;;  %2471 = vmatpush1.bf16.msra.mxu0 %v4109_v17  ;;  %v5020_v13 = vld [vmem:[#allocation4 + $0x10] sm:$0xff]  ;;  %v403_v17 = vlaneseq }
  0xe6   : > { %2425 = vmatprep.subr.bf16.mxu1 %v3974_v20  ;;  %v953_v20 = vld [vmem:[#allocation4 + $0x380] sm:$0xff]  ;;  %v3953_v15 = vcombine.low %v5020_v13, %v5022_v14  ;;  %v3954_v16 = vcombine.high %v5020_v13, %v5022_v14  ;;  %v1002_v14 = vld [vmem:[#allocation4 + $0x508] sm:$0xff] }
  0xe7   : > { %v4061_v34 = vcombine.low %v953_v20, %v957_v21 }
  0xe9   : > { %2426 = vmatpush1.bf16.msra.mxu1 %v3973_v23  ;;  %v1013_v23 = vld [vmem:[#allocation4 + $0x560] sm:$0xff] }
  0xea   : > { %2427 = vmatprep.subr.bf16.mxu1 %v3982_v24  ;;  %v4118_v24 = vcombine.high %v1009_v22, %v1013_v23  ;;  %v4117_v25 = vcombine.low %v1009_v22, %v1013_v23 }
  0xec   : > { %2472 = vmatprep.subr.bf16.mxu0 %v4118_v24 }
  0xed   : > { %2428 = vmatpush1.bf16.msra.mxu1 %v3981_v27  ;;  %v4062_v27 = vcombine.high %v953_v20, %v957_v21  ;;  %2473 = vmatpush1.bf16.msra.mxu0 %v4117_v25  ;;  %v5036_v20 = vld [vmem:[%s5133_s2] sm:$0xf] }
  0xee   : > { %2429 = vmatprep.subr.bf16.mxu1 %v3990_v28  ;;  %v961_v28 = vld [vmem:[#allocation4 + $0x3c0] sm:$0xff] }
  0xf1   : > { %2430 = vmatpush1.bf16.msra.mxu1 %v3989_v31  ;;  %v1021_v31 = vld [vmem:[#allocation4 + $0x5a0] sm:$0xff] }
  0xf2   : > { %2431 = vmatprep.subr.bf16.mxu1 %v3998_v32  ;;  %v4126_v32 = vcombine.high %v1017_v30, %v1021_v31  ;;  %v4125_v33 = vcombine.low %v1017_v30, %v1021_v31 }
  0xf4   : > { %2474 = vmatprep.subr.bf16.mxu0 %v4126_v32 }
  0xf5   : > { %2432 = vmatpush1.bf16.msra.mxu1 %v3997_v35  ;;  %v4070_v35 = vcombine.high %v961_v28, %v965_v29  ;;  %2475 = vmatpush1.bf16.msra.mxu0 %v4125_v33 }
  0xf6   : > { %2433 = vmatprep.subr.bf16.mxu1 %v4006_v36  ;;  %v1025_v36 = vld [vmem:[#allocation4 + $0x5c0] sm:$0xff] }
  0xf7   : > { %v4134_v38 = vcombine.high %v1025_v36, %v1029_v37 }
  0xf9   : > { %2434 = vmatpush1.bf16.msra.mxu1 %v4005_v39  ;;  %v4133_v39 = vcombine.low %v1025_v36, %v1029_v37  ;;  %2476 = vmatprep.subr.bf16.mxu0 %v4134_v38  ;;  %v850_v36 = vld [vmem:[#allocation4 + $0x48] sm:$0xff] }
  0xfa   : > { %2435 = vmatprep.subr.bf16.mxu1 %v4014_v40  ;;  %v4069_v40 = vcombine.low %v961_v28, %v965_v29  ;;  %v854_v37 = vld [vmem:[#allocation4 + $0x68] sm:$0xff] }
  0xfb   : > { %2477 = vmatpush1.bf16.msra.mxu0 %v4133_v39  ;;  %v3959_v44 = vcombine.low %v850_v36, %v854_v37 }
  0xfc   : > { %2478 = vmatprep.subr.bf16.mxu0 %v4142_v45 }
  0xfd   : > { %2436 = vmatpush1.bf16.msra.mxu1 %v4013_v50  ;;  %v1045_v50 = vld [vmem:[#allocation4 + $0x660] sm:$0xff] }
  0xfe   : > { %2437 = vmatprep.subr.bf16.mxu1 %v4022_v51  ;;  %v4150_v51 = vcombine.high %v1041_v49, %v1045_v50  ;;  %v4149_v52 = vcombine.low %v1041_v49, %v1045_v50  ;;  %v870_v49 = vld [vmem:[#allocation4 + $0xe8] sm:$0xff] }
  0xff   : > { %2479 = vmatpush1.bf16.msra.mxu0 %v4141_v46  ;;  %v866_v46 = vld [vmem:[#allocation4 + $0xc8] sm:$0xff] }
 0x100   : > { %2480 = vmatprep.subr.bf16.mxu0 %v4150_v51  ;;  %v3976_v51 = vcombine.high %v866_v46, %v870_v49  ;;  %v3975_v54 = vcombine.low %v866_v46, %v870_v49 }
 0x101   : > { %2438 = vmatpush1.bf16.msra.mxu1 %v4021_v58  ;;  %v1061_v58 = vld [vmem:[#allocation4 + $0x6e0] sm:$0xff] }
 0x102   : > { %2439 = vmatprep.subr.bf16.mxu1 %v4030_v59  ;;  %v4166_v59 = vcombine.high %v1057_v57, %v1061_v58  ;;  %v4165_v60 = vcombine.low %v1057_v57, %v1061_v58  ;;  %v890_v57 = vld [vmem:[#allocation4 + $0x188] sm:$0xff] }
 0x103   : > { %2481 = vmatpush1.bf16.msra.mxu0 %v4149_v52  ;;  %v874_v52 = vld [vmem:[#allocation4 + $0x108] sm:$0xff] }
 0x104   : > { %2482 = vmatprep.subr.bf16.mxu0 %v4158_v55  ;;  %v3984_v55 = vcombine.high %v874_v52, %v878_v53  ;;  %v3983_v47 = vcombine.low %v874_v52, %v878_v53  ;;  %v894_v58 = vld [vmem:[#allocation4 + $0x1a8] sm:$0xff] }
 0x105   : > { %2440 = vmatpush1.bf16.msra.mxu1 %v4029_v2  ;;  %v1077_v2 = vld [vmem:[#allocation4 + $0x760] sm:$0xff] }
 0x106   : > { %2441 = vmatprep.subr.bf16.mxu1 %v4038_v3  ;;  %v4182_v3 = vcombine.high %v1073_v1, %v1077_v2  ;;  %v4181_v4 = vcombine.low %v1073_v1, %v1077_v2  ;;  %v906_v1 = vld [vmem:[#allocation4 + $0x208] sm:$0xff] }
 0x107   : > { %2483 = vmatpush1.bf16.msra.mxu0 %v4157_v56  ;;  %v882_v56 = vld [vmem:[#allocation4 + $0x148] sm:$0xff] }
 0x108   : > { %2484 = vmatprep.subr.bf16.mxu0 %v4166_v59  ;;  %v3991_v59 = vcombine.low %v882_v56, %v886_v43  ;;  %v910_v2 = vld [vmem:[#allocation4 + $0x228] sm:$0xff] }
 0x109   : > { %2442 = vmatpush1.bf16.msra.mxu1 %v4037_v10  ;;  %v1093_v10 = vld [vmem:[#allocation4 + $0x7e0] sm:$0xff] }
 0x10a   : > { %2443 = vmatprep.subr.bf16.mxu1 %v4046_v11  ;;  %v4198_v11 = vcombine.high %v1089_v9, %v1093_v10  ;;  %v4197_v12 = vcombine.low %v1089_v9, %v1093_v10  ;;  %v922_v9 = vld [vmem:[#allocation4 + $0x288] sm:$0xff] }
 0x10b   : > { %2485 = vmatpush1.bf16.msra.mxu0 %v4165_v60  ;;  %v4000_v60 = vcombine.high %v890_v57, %v894_v58  ;;  %v926_v10 = vld [vmem:[#allocation4 + $0x2a8] sm:$0xff] }
 0x10c   : > { %2486 = vmatprep.subr.bf16.mxu0 %v4174_v63  ;;  %v3999_v63 = vcombine.low %v890_v57, %v894_v58 }
 0x10d   : > { %2444 = vmatpush1.bf16.msra.mxu1 %v4045_v18  ;;  %v5028_v18 = vshrl.u32 %v403_v17, 7  ;;  %v934_v17 = vld [vmem:[#allocation4 + $0x2e8] sm:$0xff] }
 0x10e   : > { %2445 = vmatprep.subr.bf16.mxu1 %v4054_v19 }
 0x10f   : > { %2487 = vmatpush1.bf16.msra.mxu0 %v4173_v0  ;;  %v5031_v19 = vsub.s32 0, %v5028_v18  ;;  %v5039_v21 = vsub.s32 1, %v5028_v18  ;;  %v4008_v0 = vcombine.high %v898_v61, %v902_v62 }
 0x110   : > { %2488 = vmatprep.subr.bf16.mxu0 %v4182_v3  ;;  %v4007_v3 = vcombine.low %v898_v61, %v902_v62  ;;  %v978_v61 = vld [vmem:[#allocation4 + $0x448] sm:$0xff] }
 0x111   : > { %2446 = vmatpush1.bf16.msra.mxu1 %v4053_v26  ;;  %v406_v22 = vrot.slane %v5036_v20, %v5031_v19  ;;  %v410_v23 = vrot.slane %v5036_v20, %v5039_v21 }
 0x112   : > { %2447 = vmatprep.subr.bf16.mxu1 %v4062_v27 }
 0x113   : > { %2489 = vmatpush1.bf16.msra.mxu0 %v4181_v4  ;;  %v4016_v4 = vcombine.high %v906_v1, %v910_v2 }
 0x114   : > { %2490 = vmatprep.subr.bf16.mxu0 %v4190_v7  ;;  %v4015_v7 = vcombine.low %v906_v1, %v910_v2  ;;  %v855_v1 = vld [vmem:[#allocation4 + $0x70] sm:$0xff] }
 0x115   : > { %2448 = vmatpush1.bf16.msra.mxu1 %v4061_v34 }
 0x116   : > { %2449 = vmatprep.subr.bf16.mxu1 %v4070_v35 }
 0x117   : > { %2491 = vmatpush1.bf16.msra.mxu0 %v4189_v8  ;;  %v4024_v8 = vcombine.high %v914_v5, %v918_v6 }
 0x118   : > { %2492 = vmatprep.subr.bf16.mxu0 %v4198_v11  ;;  %v4023_v11 = vcombine.low %v914_v5, %v918_v6  ;;  %v986_v6 = vld [vmem:[#allocation4 + $0x488] sm:$0xff] }
 0x119   : > { %2450 = vmatpush1.bf16.msra.mxu1 %v4069_v40  ;;  %v3960_v40 = vcombine.high %v850_v36, %v854_v37 }
 0x11a   : > { %2505 = vmatprep.subr.bf16.mxu1 %v3952_v41  ;;  %v858_v41 = vld [vmem:[#allocation4 + $0x88] sm:$0xff] }
 0x11b   : > { %2493 = vmatpush1.bf16.msra.mxu0 %v4197_v12  ;;  %v3968_v45 = vcombine.high %v858_v41, %v862_v42  ;;  %v3967_v50 = vcombine.low %v858_v41, %v862_v42  ;;  %v4032_v12 = vcombine.high %v922_v9, %v926_v10  ;;  %v962_v42 = vld [vmem:[#allocation4 + $0x3c8] sm:$0xff] }
 0x11c   : > { %2591 = vmatprep.subr.bf16.mxu0 %v3954_v16  ;;  %v930_v16 = vld [vmem:[#allocation4 + $0x2c8] sm:$0xff] }
 0x16f   : > { %v777_v24 = vpop.f32.mrb[0].mxu1 }
 0x170   : > { %v778_v25 = vadd.f32 %v777_v24, %v406_v22  ;;  %v779_v26 = vpop.f32.mrb[1].mxu1  ;;  %v938_v24 = vld [vmem:[#allocation4 + $0x308] sm:$0xff] }
 0x171   : > { %v780_v27 = vadd.f32 %v779_v26, %v410_v23  ;;  %v781_v28 = vpop.f32.mrb[2].mxu1  ;;  %v4039_v26 = vcombine.low %v930_v16, %v934_v17 }
 0x172   : > { %v782_v29 = vadd.f32 %v781_v28, %v406_v22  ;;  %v783_v30 = vpop.f32.mrb[3].mxu1  ;;  %v829_v32 = vmax.f32 %v778_v25, 0.0  ;;  %v4031_v22 = vcombine.low %v922_v9, %v926_v10  ;;  %v942_v25 = vld [vmem:[#allocation4 + $0x328] sm:$0xff]  ;;  %v863_v9 = vld [vmem:[#allocation4 + $0xb0] sm:$0xff] }
 0x173   : > { %v784_v31 = vadd.f32 %v783_v30, %v410_v23  ;;  %v830_v34 = vmax.f32 %v780_v27, 0.0  ;;  %v4040_v23 = vcombine.high %v930_v16, %v934_v17  ;;  %v4048_v27 = vcombine.high %v938_v24, %v942_v25  ;;  %v946_v28 = vld [vmem:[#allocation4 + $0x348] sm:$0xff] }
 0x174   : > { %v833_v33 = vmax.f32 %v782_v29, 0.0  ;;  %v950_v29 = vld [vmem:[#allocation4 + $0x368] sm:$0xff]  ;;  %v4047_v30 = vcombine.low %v938_v24, %v942_v25  ;;  %v871_v24 = vld [vmem:[#allocation4 + $0xf0] sm:$0xff] }
 0x175   : > { %v834_v35 = vmax.f32 %v784_v31, 0.0  ;;  %v4056_v31 = vcombine.high %v946_v28, %v950_v29  ;;  %v4055_v36 = vcombine.low %v946_v28, %v950_v29  ;;  %v994_v17 = vld [vmem:[#allocation4 + $0x4c8] sm:$0xff]  ;;  %v875_v28 = vld [vmem:[#allocation4 + $0x110] sm:$0xff] }
 0x176   : > { %v5045_v38 = vpack.c.bf16 %v833_v33, %v829_v32  ;;  %v413_v32 = vsub.s32 2, %v5028_v18  ;;  %v417_v33 = vsub.s32 3, %v5028_v18  ;;  %v879_v29 = vld [vmem:[#allocation4 + $0x130] sm:$0xff] }
 0x177   : > { %v5047_v39 = vpack.c.bf16 %v834_v35, %v830_v34  ;;  %v954_v34 = vld [vmem:[#allocation4 + $0x388] sm:$0xff] }
 0x178   : > { %v958_v35 = vld [vmem:[#allocation4 + $0x3a8] sm:$0xff]  ;;  %v414_v37 = vrot.slane %v5036_v20, %v413_v32  ;;  %v418_v41 = vrot.slane %v5036_v20, %v417_v33 }
 0x179   : > { %2451 = vmatprep.mubr.bf16.mxu1 %v5047_v39  ;;  %v4063_v46 = vcombine.low %v954_v34, %v958_v35 }
 0x17a   : > { %2452 = vmatmul.mubr.bf16.vlgmr.msra.gmra.mrb[8].mxu1 %v5045_v38 }
 0x17b   : > { %2506 = vmatpush1.bf16.msra.mxu1 %v3951_v48  ;;  %2537 = vmatprep.mubr.bf16.mxu1 %v5047_v39  ;;  %v3992_v48 = vcombine.high %v882_v56, %v886_v43 }
 0x17c   : > { %2507 = vmatprep.subr.bf16.mxu1 %v3960_v40  ;;  %v4064_v40 = vcombine.high %v954_v34, %v958_v35  ;;  %v3986_v35 = vcombine.high %v875_v28, %v879_v29 }
 0x17f   : > { %2508 = vmatpush1.bf16.msra.mxu1 %v3959_v44  ;;  %v966_v44 = vld [vmem:[#allocation4 + $0x3e8] sm:$0xff] }
 0x180   : > { %2509 = vmatprep.subr.bf16.mxu1 %v3968_v45 }
 0x183   : > { %2510 = vmatpush1.bf16.msra.mxu1 %v3967_v50 }
 0x184   : > { %2511 = vmatprep.subr.bf16.mxu1 %v3976_v51  ;;  %v4072_v51 = vcombine.high %v962_v42, %v966_v44 }
 0x187   : > { %2512 = vmatpush1.bf16.msra.mxu1 %v3975_v54  ;;  %v970_v54 = vld [vmem:[#allocation4 + $0x408] sm:$0xff] }
 0x188   : > { %2513 = vmatprep.subr.bf16.mxu1 %v3984_v55  ;;  %v974_v55 = vld [vmem:[#allocation4 + $0x428] sm:$0xff] }
 0x189   : > { %v4080_v58 = vcombine.high %v970_v54, %v974_v55 }
 0x18b   : > { %2514 = vmatpush1.bf16.msra.mxu1 %v3983_v47 }
 0x18c   : > { %2515 = vmatprep.subr.bf16.mxu1 %v3992_v48  ;;  %v4071_v48 = vcombine.low %v962_v42, %v966_v44  ;;  %v3985_v44 = vcombine.low %v875_v28, %v879_v29  ;;  %v1062_v28 = vld [vmem:[#allocation4 + $0x6e8] sm:$0xff]  ;;  %v931_v29 = vld [vmem:[#allocation4 + $0x2d0] sm:$0xff] }
 0x18f   : > { %2516 = vmatpush1.bf16.msra.mxu1 %v3991_v59 }
 0x190   : > { %2517 = vmatprep.subr.bf16.mxu1 %v4000_v60 }
 0x193   : > { %2518 = vmatpush1.bf16.msra.mxu1 %v3999_v63  ;;  %v982_v63 = vld [vmem:[#allocation4 + $0x468] sm:$0xff] }
 0x194   : > { %2519 = vmatprep.subr.bf16.mxu1 %v4008_v0  ;;  %v851_v0 = vld [vmem:[#allocation4 + $0x50] sm:$0xff]  ;;  %v4087_v10 = vcombine.low %v978_v61, %v982_v63 }
 0x195   : > { %v3962_v5 = vcombine.high %v851_v0, %v855_v1 }
 0x197   : > { %2520 = vmatpush1.bf16.msra.mxu1 %v4007_v3  ;;  %v4079_v3 = vcombine.low %v970_v54, %v974_v55 }
 0x198   : > { %2521 = vmatprep.subr.bf16.mxu1 %v4016_v4  ;;  %v4088_v4 = vcombine.high %v978_v61, %v982_v63  ;;  %v1034_v61 = vld [vmem:[#allocation4 + $0x608] sm:$0xff] }
 0x199   : > { %v1038_v63 = vld [vmem:[#allocation4 + $0x628] sm:$0xff] }
 0x19b   : > { %2522 = vmatpush1.bf16.msra.mxu1 %v4015_v7  ;;  %v990_v7 = vld [vmem:[#allocation4 + $0x4a8] sm:$0xff] }
 0x19c   : > { %2523 = vmatprep.subr.bf16.mxu1 %v4024_v8  ;;  %v859_v8 = vld [vmem:[#allocation4 + $0x90] sm:$0xff]  ;;  %v4095_v25 = vcombine.low %v986_v6, %v990_v7 }
 0x19d   : > { %v3970_v16 = vcombine.high %v859_v8, %v863_v9 }
 0x19f   : > { %2524 = vmatpush1.bf16.msra.mxu1 %v4023_v11  ;;  %v3961_v11 = vcombine.low %v851_v0, %v855_v1  ;;  %v907_v0 = vld [vmem:[#allocation4 + $0x210] sm:$0xff] }
 0x1a0   : > { %2525 = vmatprep.subr.bf16.mxu1 %v4032_v12  ;;  %v4096_v12 = vcombine.high %v986_v6, %v990_v7  ;;  %v911_v1 = vld [vmem:[#allocation4 + $0x230] sm:$0xff]  ;;  %v1042_v7 = vld [vmem:[#allocation4 + $0x648] sm:$0xff] }
 0x1a1   : > { %v4018_v6 = vcombine.high %v907_v0, %v911_v1 }
 0x1a3   : > { %2526 = vmatpush1.bf16.msra.mxu1 %v4031_v22  ;;  %v998_v22 = vld [vmem:[#allocation4 + $0x4e8] sm:$0xff] }
 0x1a4   : > { %2527 = vmatprep.subr.bf16.mxu1 %v4040_v23  ;;  %v867_v23 = vld [vmem:[#allocation4 + $0xd0] sm:$0xff] }
 0x1a5   : > { %v3978_v13 = vcombine.high %v867_v23, %v871_v24 }
 0x1a7   : > { %2528 = vmatpush1.bf16.msra.mxu1 %v4039_v26  ;;  %v3969_v26 = vcombine.low %v859_v8, %v863_v9  ;;  %v1046_v8 = vld [vmem:[#allocation4 + $0x668] sm:$0xff]  ;;  %v915_v9 = vld [vmem:[#allocation4 + $0x250] sm:$0xff] }
 0x1a8   : > { %2529 = vmatprep.subr.bf16.mxu1 %v4048_v27  ;;  %v4104_v27 = vcombine.high %v994_v17, %v998_v22 }
 0x1ab   : > { %2530 = vmatpush1.bf16.msra.mxu1 %v4047_v30  ;;  %v4103_v30 = vcombine.low %v994_v17, %v998_v22  ;;  %v1050_v22 = vld [vmem:[#allocation4 + $0x688] sm:$0xff] }
 0x1ac   : > { %2531 = vmatprep.subr.bf16.mxu1 %v4056_v31  ;;  %v3977_v31 = vcombine.low %v867_v23, %v871_v24  ;;  %v1054_v23 = vld [vmem:[#allocation4 + $0x6a8] sm:$0xff]  ;;  %v923_v24 = vld [vmem:[#allocation4 + $0x290] sm:$0xff] }
 0x1af   : > { %2532 = vmatpush1.bf16.msra.mxu1 %v4055_v36  ;;  %v820_v45 = vpop.f32.mrb[4].mxu1  ;;  %v1010_v36 = vld [vmem:[#allocation4 + $0x548] sm:$0xff] }
 0x1b0   : > { %v821_v49 = vadd.f32 %v820_v45, %v414_v37  ;;  %v822_v50 = vpop.f32.mrb[5].mxu1  ;;  %2533 = vmatprep.subr.bf16.mxu1 %v4064_v40  ;;  %v883_v40 = vld [vmem:[#allocation4 + $0x150] sm:$0xff] }
 0x1b1   : > { %v823_v52 = vadd.f32 %v822_v50, %v418_v41  ;;  %v824_v53 = vpop.f32.mrb[6].mxu1  ;;  %v1022_v50 = vld [vmem:[#allocation4 + $0x5a8] sm:$0xff] }
 0x1b2   : > { %v825_v56 = vadd.f32 %v824_v53, %v414_v37  ;;  %v826_v43 = vpop.f32.mrb[7].mxu1  ;;  %v831_v57 = vmax.f32 %v821_v49, 0.0  ;;  %v1014_v37 = vld [vmem:[#allocation4 + $0x568] sm:$0xff] }
 0x1b3   : > { %v827_v47 = vadd.f32 %v826_v43, %v418_v41  ;;  %2534 = vmatpush1.bf16.msra.mxu1 %v4063_v46  ;;  %v832_v59 = vmax.f32 %v823_v52, 0.0  ;;  %v887_v41 = vld [vmem:[#allocation4 + $0x170] sm:$0xff]  ;;  %v4120_v45 = vcombine.high %v1010_v36, %v1014_v37  ;;  %v1018_v49 = vld [vmem:[#allocation4 + $0x588] sm:$0xff]  ;;  %v4119_v53 = vcombine.low %v1010_v36, %v1014_v37 }
 0x1b4   : > { %v835_v20 = vmax.f32 %v825_v56, 0.0  ;;  %2535 = vmatprep.subr.bf16.mxu1 %v4072_v51  ;;  %v3994_v46 = vcombine.high %v883_v40, %v887_v41  ;;  %v891_v51 = vld [vmem:[#allocation4 + $0x190] sm:$0xff]  ;;  %v3993_v54 = vcombine.low %v883_v40, %v887_v41  ;;  %v4128_v55 = vcombine.high %v1018_v49, %v1022_v50  ;;  %v1026_v43 = vld [vmem:[#allocation4 + $0x5c8] sm:$0xff] }
 0x1b5   : > { %v836_v60 = vmax.f32 %v827_v47, 0.0  ;;  %v895_v52 = vld [vmem:[#allocation4 + $0x1b0] sm:$0xff]  ;;  %v1030_v47 = vld [vmem:[#allocation4 + $0x5e8] sm:$0xff] }
 0x1b6   : > { %v5063_v62 = vpack.c.bf16 %v835_v20, %v831_v57  ;;  %v4002_v56 = vcombine.high %v891_v51, %v895_v52  ;;  %v903_v57 = vld [vmem:[#allocation4 + $0x1f0] sm:$0xff]  ;;  %v4127_v20 = vcombine.low %v1018_v49, %v1022_v50  ;;  %v1066_v37 = vld [vmem:[#allocation4 + $0x708] sm:$0xff] }
 0x1b7   : > { %v5065_v2 = vpack.c.bf16 %v836_v60, %v832_v59  ;;  %2536 = vmatpush1.bf16.msra.mxu1 %v4071_v48  ;;  %v899_v48 = vld [vmem:[#allocation4 + $0x1d0] sm:$0xff]  ;;  %v4136_v59 = vcombine.high %v1026_v43, %v1030_v47  ;;  %v1070_v40 = vld [vmem:[#allocation4 + $0x728] sm:$0xff] }
 0x1b8   : > { %2548 = vmatprep.subr.bf16.mxu1 %v4080_v58  ;;  %v4001_v58 = vcombine.low %v891_v51, %v895_v52  ;;  %v4010_v60 = vcombine.high %v899_v48, %v903_v57  ;;  %v939_v41 = vld [vmem:[#allocation4 + $0x310] sm:$0xff]  ;;  %v1074_v50 = vld [vmem:[#allocation4 + $0x748] sm:$0xff] }
 0x1b9   : > { %2494 = vmatprep.mubr.bf16.mxu0 %v5065_v2  ;;  %v1078_v51 = vld [vmem:[#allocation4 + $0x768] sm:$0xff]  ;;  %v947_v52 = vld [vmem:[#allocation4 + $0x350] sm:$0xff] }
 0x1ba   : > { %2538 = vmatmul.mubr.bf16.vlgmr.msra.gmra.mrb[12].mxu1 %v5045_v38  ;;  %2495 = vmatmul.mubr.bf16.vlgmr.msra.gmra.mrb[0].mxu0 %v5063_v62 }
 0x1bb   : > { %2549 = vmatpush1.bf16.msra.mxu1 %v4079_v3  ;;  %2580 = vmatprep.mubr.bf16.mxu1 %v5065_v2  ;;  %v4135_v3 = vcombine.low %v1026_v43, %v1030_v47  ;;  %v1082_v47 = vld [vmem:[#allocation4 + $0x788] sm:$0xff] }
 0x1bc   : > { %2592 = vmatpush1.bf16.msra.mxu0 %v3953_v15  ;;  %2623 = vmatprep.mubr.bf16.mxu0 %v5047_v39  ;;  %v1006_v15 = vld [vmem:[#allocation4 + $0x528] sm:$0xff] }
 0x1bd   : > { %2550 = vmatprep.subr.bf16.mxu1 %v4088_v4  ;;  %2593 = vmatprep.subr.bf16.mxu0 %v3962_v5  ;;  %v4112_v34 = vcombine.high %v1002_v14, %v1006_v15  ;;  %v4111_v42 = vcombine.low %v1002_v14, %v1006_v15  ;;  %v4009_v4 = vcombine.low %v899_v48, %v903_v57  ;;  %v1058_v15 = vld [vmem:[#allocation4 + $0x6c8] sm:$0xff]  ;;  %v955_v57 = vld [vmem:[#allocation4 + $0x390] sm:$0xff] }
 0x1be   : > { %v4144_v5 = vcombine.high %v1034_v61, %v1038_v63  ;;  %v1086_v48 = vld [vmem:[#allocation4 + $0x7a8] sm:$0xff] }
 0x1bf   : > { %2551 = vmatpush1.bf16.msra.mxu1 %v4087_v10  ;;  %v919_v10 = vld [vmem:[#allocation4 + $0x270] sm:$0xff] }
 0x1c0   : > { %2594 = vmatpush1.bf16.msra.mxu0 %v3961_v11  ;;  %2552 = vmatprep.subr.bf16.mxu1 %v4096_v12  ;;  %v4143_v11 = vcombine.low %v1034_v61, %v1038_v63  ;;  %v4017_v12 = vcombine.low %v907_v0, %v911_v1  ;;  %v4026_v17 = vcombine.high %v915_v9, %v919_v10  ;;  %v1090_v63 = vld [vmem:[#allocation4 + $0x7c8] sm:$0xff]  ;;  %v963_v1 = vld [vmem:[#allocation4 + $0x3d0] sm:$0xff] }
 0x1c1   : > { %2595 = vmatprep.subr.bf16.mxu0 %v3970_v16  ;;  %v4152_v16 = vcombine.high %v1042_v7, %v1046_v8  ;;  %v1094_v0 = vld [vmem:[#allocation4 + $0x7e8] sm:$0xff] }
 0x1c3   : > { %2553 = vmatpush1.bf16.msra.mxu1 %v4095_v25  ;;  %v927_v25 = vld [vmem:[#allocation4 + $0x2b0] sm:$0xff] }
 0x1c4   : > { %2596 = vmatpush1.bf16.msra.mxu0 %v3969_v26  ;;  %2554 = vmatprep.subr.bf16.mxu1 %v4104_v27  ;;  %v4151_v26 = vcombine.low %v1042_v7, %v1046_v8  ;;  %v4025_v27 = vcombine.low %v915_v9, %v919_v10  ;;  %v4034_v14 = vcombine.high %v923_v24, %v927_v25  ;;  %v844_v8 = vld [vmem:[#allocation4 + $0x18] sm:$0xff]  ;;  %v971_v10 = vld [vmem:[#allocation4 + $0x410] sm:$0xff] }
 0x1c5   : > { %2597 = vmatprep.subr.bf16.mxu0 %v3978_v13  ;;  %v4160_v13 = vcombine.high %v1050_v22, %v1054_v23  ;;  %v848_v9 = vld [vmem:[#allocation4 + $0x38] sm:$0xff] }
 0x1c7   : > { %2555 = vmatpush1.bf16.msra.mxu1 %v4103_v30  ;;  %v935_v30 = vld [vmem:[#allocation4 + $0x2f0] sm:$0xff] }
 0x1c8   : > { %2598 = vmatpush1.bf16.msra.mxu0 %v3977_v31  ;;  %2556 = vmatprep.subr.bf16.mxu1 %v4112_v34  ;;  %v4159_v31 = vcombine.low %v1050_v22, %v1054_v23  ;;  %v4033_v34 = vcombine.low %v923_v24, %v927_v25  ;;  %v4042_v36 = vcombine.high %v931_v29, %v935_v30  ;;  %v979_v23 = vld [vmem:[#allocation4 + $0x450] sm:$0xff] }
 0x1c9   : > { %2599 = vmatprep.subr.bf16.mxu0 %v3986_v35  ;;  %v4168_v35 = vcombine.high %v1058_v15, %v1062_v28  ;;  %v983_v24 = vld [vmem:[#allocation4 + $0x470] sm:$0xff]  ;;  %v3955_v25 = vcombine.low %v844_v8, %v848_v9 }
 0x1cb   : > { %2557 = vmatpush1.bf16.msra.mxu1 %v4111_v42  ;;  %v943_v42 = vld [vmem:[#allocation4 + $0x330] sm:$0xff] }
 0x1cc   : > { %2600 = vmatpush1.bf16.msra.mxu0 %v3985_v44  ;;  %2558 = vmatprep.subr.bf16.mxu1 %v4120_v45  ;;  %v4167_v44 = vcombine.low %v1058_v15, %v1062_v28  ;;  %v4041_v45 = vcombine.low %v931_v29, %v935_v30  ;;  %v4050_v49 = vcombine.high %v939_v41, %v943_v42  ;;  %v860_v15 = vld [vmem:[#allocation4 + $0x98] sm:$0xff]  ;;  %v987_v30 = vld [vmem:[#allocation4 + $0x490] sm:$0xff] }
 0x1cd   : > { %2601 = vmatprep.subr.bf16.mxu0 %v3994_v46  ;;  %v4176_v46 = vcombine.high %v1066_v37, %v1070_v40  ;;  %v864_v28 = vld [vmem:[#allocation4 + $0xb8] sm:$0xff] }
 0x1cf   : > { %2559 = vmatpush1.bf16.msra.mxu1 %v4119_v53  ;;  %v951_v53 = vld [vmem:[#allocation4 + $0x370] sm:$0xff] }
 0x1d0   : > { %2602 = vmatpush1.bf16.msra.mxu0 %v3993_v54  ;;  %2560 = vmatprep.subr.bf16.mxu1 %v4128_v55  ;;  %v4175_v54 = vcombine.low %v1066_v37, %v1070_v40  ;;  %v4049_v55 = vcombine.low %v939_v41, %v943_v42  ;;  %v4058_v43 = vcombine.high %v947_v52, %v951_v53  ;;  %v868_v40 = vld [vmem:[#allocation4 + $0xd8] sm:$0xff]  ;;  %v995_v42 = vld [vmem:[#allocation4 + $0x4d0] sm:$0xff] }
 0x1d1   : > { %2603 = vmatprep.subr.bf16.mxu0 %v4002_v56  ;;  %v4184_v56 = vcombine.high %v1074_v50, %v1078_v51  ;;  %v872_v41 = vld [vmem:[#allocation4 + $0xf8] sm:$0xff] }
 0x1d3   : > { %2561 = vmatpush1.bf16.msra.mxu1 %v4127_v20  ;;  %v959_v20 = vld [vmem:[#allocation4 + $0x3b0] sm:$0xff] }
 0x1d4   : > { %2604 = vmatpush1.bf16.msra.mxu0 %v4001_v58  ;;  %2562 = vmatprep.subr.bf16.mxu1 %v4136_v59  ;;  %v4183_v58 = vcombine.low %v1074_v50, %v1078_v51  ;;  %v4057_v59 = vcombine.low %v947_v52, %v951_v53  ;;  %v4066_v61 = vcombine.high %v955_v57, %v959_v20  ;;  %v876_v51 = vld [vmem:[#allocation4 + $0x118] sm:$0xff]  ;;  %v1003_v53 = vld [vmem:[#allocation4 + $0x510] sm:$0xff] }
 0x1d5   : > { %2605 = vmatprep.subr.bf16.mxu0 %v4010_v60  ;;  %v4192_v60 = vcombine.high %v1082_v47, %v1086_v48  ;;  %v880_v52 = vld [vmem:[#allocation4 + $0x138] sm:$0xff] }
 0x1d7   : > { %2563 = vmatpush1.bf16.msra.mxu1 %v4135_v3  ;;  %v967_v3 = vld [vmem:[#allocation4 + $0x3f0] sm:$0xff] }
 0x1d8   : > { %2606 = vmatpush1.bf16.msra.mxu0 %v4009_v4  ;;  %2564 = vmatprep.subr.bf16.mxu1 %v4144_v5  ;;  %v4191_v4 = vcombine.low %v1082_v47, %v1086_v48  ;;  %v4065_v5 = vcombine.low %v955_v57, %v959_v20  ;;  %v4074_v7 = vcombine.high %v963_v1, %v967_v3  ;;  %v884_v47 = vld [vmem:[#allocation4 + $0x158] sm:$0xff]  ;;  %v1011_v57 = vld [vmem:[#allocation4 + $0x550] sm:$0xff] }
 0x1d9   : > { %2607 = vmatprep.subr.bf16.mxu0 %v4018_v6  ;;  %v4200_v6 = vcombine.high %v1090_v63, %v1094_v0  ;;  %v888_v48 = vld [vmem:[#allocation4 + $0x178] sm:$0xff]  ;;  %v1015_v20 = vld [vmem:[#allocation4 + $0x570] sm:$0xff] }
 0x1db   : > { %2565 = vmatpush1.bf16.msra.mxu1 %v4143_v11  ;;  %v975_v11 = vld [vmem:[#allocation4 + $0x430] sm:$0xff] }
 0x1dc   : > { %2608 = vmatpush1.bf16.msra.mxu0 %v4017_v12  ;;  %2566 = vmatprep.subr.bf16.mxu1 %v4152_v16  ;;  %v4199_v12 = vcombine.low %v1090_v63, %v1094_v0  ;;  %v4073_v16 = vcombine.low %v963_v1, %v967_v3  ;;  %v4082_v22 = vcombine.high %v971_v10, %v975_v11  ;;  %v892_v63 = vld [vmem:[#allocation4 + $0x198] sm:$0xff]  ;;  %v1019_v1 = vld [vmem:[#allocation4 + $0x590] sm:$0xff] }
 0x1dd   : > { %2609 = vmatprep.subr.bf16.mxu0 %v4026_v17  ;;  %v3956_v17 = vcombine.high %v844_v8, %v848_v9  ;;  %v896_v0 = vld [vmem:[#allocation4 + $0x1b8] sm:$0xff]  ;;  %v1023_v3 = vld [vmem:[#allocation4 + $0x5b0] sm:$0xff] }
 0x1de   : > { %v900_v8 = vld [vmem:[#allocation4 + $0x1d8] sm:$0xff] }
 0x1df   : > { %2567 = vmatpush1.bf16.msra.mxu1 %v4151_v26  ;;  %v852_v26 = vld [vmem:[#allocation4 + $0x58] sm:$0xff] }
 0x1e0   : > { %2610 = vmatpush1.bf16.msra.mxu0 %v4025_v27  ;;  %2568 = vmatprep.subr.bf16.mxu1 %v4160_v13  ;;  %v856_v27 = vld [vmem:[#allocation4 + $0x78] sm:$0xff]  ;;  %v4081_v13 = vcombine.low %v971_v10, %v975_v11  ;;  %v1027_v10 = vld [vmem:[#allocation4 + $0x5d0] sm:$0xff] }
 0x1e1   : > { %2611 = vmatprep.subr.bf16.mxu0 %v4034_v14  ;;  %v4090_v14 = vcombine.high %v979_v23, %v983_v24  ;;  %v3964_v29 = vcombine.high %v852_v26, %v856_v27  ;;  %v904_v9 = vld [vmem:[#allocation4 + $0x1f8] sm:$0xff]  ;;  %v1031_v11 = vld [vmem:[#allocation4 + $0x5f0] sm:$0xff] }
 0x1e3   : > { %2569 = vmatpush1.bf16.msra.mxu1 %v4159_v31  ;;  %v991_v31 = vld [vmem:[#allocation4 + $0x4b0] sm:$0xff] }
 0x1e4   : > { %2612 = vmatpush1.bf16.msra.mxu0 %v4033_v34  ;;  %2570 = vmatprep.subr.bf16.mxu1 %v4168_v35  ;;  %v3963_v34 = vcombine.low %v852_v26, %v856_v27  ;;  %v4089_v35 = vcombine.low %v979_v23, %v983_v24  ;;  %v4098_v37 = vcombine.high %v987_v30, %v991_v31  ;;  %v908_v23 = vld [vmem:[#allocation4 + $0x218] sm:$0xff]  ;;  %v1039_v26 = vld [vmem:[#allocation4 + $0x630] sm:$0xff] }
 0x1e5   : > { %2613 = vmatprep.subr.bf16.mxu0 %v4042_v36  ;;  %v3972_v36 = vcombine.high %v860_v15, %v864_v28  ;;  %v912_v24 = vld [vmem:[#allocation4 + $0x238] sm:$0xff]  ;;  %v4011_v27 = vcombine.low %v900_v8, %v904_v9 }
 0x1e7   : > { %2571 = vmatpush1.bf16.msra.mxu1 %v4167_v44  ;;  %v999_v44 = vld [vmem:[#allocation4 + $0x4f0] sm:$0xff] }
 0x1e8   : > { %2614 = vmatpush1.bf16.msra.mxu0 %v4041_v45  ;;  %2572 = vmatprep.subr.bf16.mxu1 %v4176_v46  ;;  %v3971_v45 = vcombine.low %v860_v15, %v864_v28  ;;  %v4097_v46 = vcombine.low %v987_v30, %v991_v31  ;;  %v4106_v50 = vcombine.high %v995_v42, %v999_v44  ;;  %v916_v28 = vld [vmem:[#allocation4 + $0x258] sm:$0xff]  ;;  %v1043_v30 = vld [vmem:[#allocation4 + $0x650] sm:$0xff] }
 0x1e9   : > { %2615 = vmatprep.subr.bf16.mxu0 %v4050_v49  ;;  %v3980_v49 = vcombine.high %v868_v40, %v872_v41  ;;  %v1047_v31 = vld [vmem:[#allocation4 + $0x670] sm:$0xff] }
 0x1eb   : > { %2573 = vmatpush1.bf16.msra.mxu1 %v4175_v54  ;;  %v1007_v54 = vld [vmem:[#allocation4 + $0x530] sm:$0xff] }
 0x1ec   : > { %2616 = vmatpush1.bf16.msra.mxu0 %v4049_v55  ;;  %2574 = vmatprep.subr.bf16.mxu1 %v4184_v56  ;;  %v4105_v55 = vcombine.low %v995_v42, %v999_v44  ;;  %v3988_v56 = vcombine.high %v876_v51, %v880_v52  ;;  %v1051_v42 = vld [vmem:[#allocation4 + $0x690] sm:$0xff] }
 0x1ed   : > { %2617 = vmatprep.subr.bf16.mxu0 %v4058_v43  ;;  %v4114_v43 = vcombine.high %v1003_v53, %v1007_v54  ;;  %v1055_v44 = vld [vmem:[#allocation4 + $0x6b0] sm:$0xff] }
 0x1ef   : > { %2575 = vmatpush1.bf16.msra.mxu1 %v4183_v58  ;;  %v3987_v58 = vcombine.low %v876_v51, %v880_v52  ;;  %v932_v51 = vld [vmem:[#allocation4 + $0x2d8] sm:$0xff] }
 0x1f0   : > { %2618 = vmatpush1.bf16.msra.mxu0 %v4057_v59  ;;  %2576 = vmatprep.subr.bf16.mxu1 %v4192_v60  ;;  %v4113_v59 = vcombine.low %v1003_v53, %v1007_v54  ;;  %v3996_v60 = vcombine.high %v884_v47, %v888_v48  ;;  %v936_v52 = vld [vmem:[#allocation4 + $0x2f8] sm:$0xff]  ;;  %v1059_v53 = vld [vmem:[#allocation4 + $0x6d0] sm:$0xff] }
 0x1f1   : > { %2619 = vmatprep.subr.bf16.mxu0 %v4066_v61  ;;  %v4122_v61 = vcombine.high %v1011_v57, %v1015_v20  ;;  %v1063_v54 = vld [vmem:[#allocation4 + $0x6f0] sm:$0xff] }
 0x1f3   : > { %2577 = vmatpush1.bf16.msra.mxu1 %v4191_v4  ;;  %v3995_v4 = vcombine.low %v884_v47, %v888_v48  ;;  %v940_v47 = vld [vmem:[#allocation4 + $0x318] sm:$0xff] }
 0x1f4   : > { %2620 = vmatpush1.bf16.msra.mxu0 %v4065_v5  ;;  %2578 = vmatprep.subr.bf16.mxu1 %v4200_v6  ;;  %v4121_v5 = vcombine.low %v1011_v57, %v1015_v20  ;;  %v4004_v6 = vcombine.high %v892_v63, %v896_v0  ;;  %v944_v48 = vld [vmem:[#allocation4 + $0x338] sm:$0xff]  ;;  %v1067_v57 = vld [vmem:[#allocation4 + $0x710] sm:$0xff] }
 0x1f5   : > { %2621 = vmatprep.subr.bf16.mxu0 %v4074_v7  ;;  %v4130_v7 = vcombine.high %v1019_v1, %v1023_v3  ;;  %v1071_v20 = vld [vmem:[#allocation4 + $0x730] sm:$0xff] }
 0x1f7   : > { %2579 = vmatpush1.bf16.msra.mxu1 %v4199_v12  ;;  %v4003_v12 = vcombine.low %v892_v63, %v896_v0  ;;  %v948_v63 = vld [vmem:[#allocation4 + $0x358] sm:$0xff] }
 0x1f8   : > { %2622 = vmatpush1.bf16.msra.mxu0 %v4073_v16  ;;  %2677 = vmatprep.subr.bf16.mxu1 %v3956_v17  ;;  %v4129_v16 = vcombine.low %v1019_v1, %v1023_v3  ;;  %v4012_v17 = vcombine.high %v900_v8, %v904_v9  ;;  %v952_v0 = vld [vmem:[#allocation4 + $0x378] sm:$0xff]  ;;  %v1075_v1 = vld [vmem:[#allocation4 + $0x750] sm:$0xff] }
 0x1f9   : > { %2634 = vmatprep.subr.bf16.mxu0 %v4082_v22  ;;  %v4138_v22 = vcombine.high %v1027_v10, %v1031_v11  ;;  %v1079_v3 = vld [vmem:[#allocation4 + $0x770] sm:$0xff]  ;;  %v956_v8 = vld [vmem:[#allocation4 + $0x398] sm:$0xff] }
 0x1fa   : > { %2581 = vmatmul.mubr.bf16.vlgmr.msra.gmra.mrb[12].mxu1 %v5063_v62  ;;  %v960_v9 = vld [vmem:[#allocation4 + $0x3b8] sm:$0xff] }
 0x1fb   : > { %2624 = vmatmul.mubr.bf16.vlgmr.msra.gmra.mrb[4].mxu0 %v5045_v38  ;;  %2678 = vmatpush1.bf16.msra.mxu1 %v3955_v25  ;;  %v1035_v25 = vld [vmem:[#allocation4 + $0x610] sm:$0xff] }
 0x1fc   : > { %2635 = vmatpush1.bf16.msra.mxu0 %v4081_v13  ;;  %2666 = vmatprep.mubr.bf16.mxu0 %v5065_v2  ;;  %v4137_v13 = vcombine.low %v1027_v10, %v1031_v11  ;;  %v4146_v15 = vcombine.high %v1035_v25, %v1039_v26  ;;  %v1083_v10 = vld [vmem:[#allocation4 + $0x790] sm:$0xff] }
 0x1fd   : > { %2709 = vmatprep.mubr.bf16.mxu1 %v5047_v39  ;;  %2636 = vmatprep.subr.bf16.mxu0 %v4090_v14  ;;  %v3979_v39 = vcombine.low %v868_v40, %v872_v41  ;;  %v4020_v14 = vcombine.high %v908_v23, %v912_v24  ;;  %v924_v40 = vld [vmem:[#allocation4 + $0x298] sm:$0xff]  ;;  %v1087_v11 = vld [vmem:[#allocation4 + $0x7b0] sm:$0xff] }
 0x1fe   : > { %2679 = vmatprep.subr.bf16.mxu1 %v3964_v29  ;;  %v920_v29 = vld [vmem:[#allocation4 + $0x278] sm:$0xff] }
 0x1ff   : > { %2680 = vmatpush1.bf16.msra.mxu1 %v3963_v34  ;;  %v4019_v34 = vcombine.low %v908_v23, %v912_v24  ;;  %v928_v41 = vld [vmem:[#allocation4 + $0x2b8] sm:$0xff] }
 0x200   : > { %2637 = vmatpush1.bf16.msra.mxu0 %v4089_v35  ;;  %2681 = vmatprep.subr.bf16.mxu1 %v3972_v36  ;;  %v4145_v35 = vcombine.low %v1035_v25, %v1039_v26  ;;  %v4028_v36 = vcombine.high %v916_v28, %v920_v29  ;;  %v964_v23 = vld [vmem:[#allocation4 + $0x3d8] sm:$0xff]  ;;  %v1091_v25 = vld [vmem:[#allocation4 + $0x7d0] sm:$0xff] }
 0x201   : > { %2638 = vmatprep.subr.bf16.mxu0 %v4098_v37  ;;  %v4154_v37 = vcombine.high %v1043_v30, %v1047_v31  ;;  %v968_v24 = vld [vmem:[#allocation4 + $0x3f8] sm:$0xff]  ;;  %v1095_v26 = vld [vmem:[#allocation4 + $0x7f0] sm:$0xff] }
 0x203   : > { %2682 = vmatpush1.bf16.msra.mxu1 %v3971_v45  ;;  %v4027_v45 = vcombine.low %v916_v28, %v920_v29  ;;  %v972_v28 = vld [vmem:[#allocation4 + $0x418] sm:$0xff] }
 0x204   : > { %2639 = vmatpush1.bf16.msra.mxu0 %v4097_v46  ;;  %2683 = vmatprep.subr.bf16.mxu1 %v3980_v49  ;;  %v4153_v46 = vcombine.low %v1043_v30, %v1047_v31  ;;  %v4036_v49 = vcombine.high %v924_v40, %v928_v41  ;;  %v976_v29 = vld [vmem:[#allocation4 + $0x438] sm:$0xff]  ;;  %v4075_v30 = vcombine.low %v964_v23, %v968_v24 }
 0x205   : > { %2640 = vmatprep.subr.bf16.mxu0 %v4106_v50  ;;  %v4162_v50 = vcombine.high %v1051_v42, %v1055_v44  ;;  %v4201_v31 = vcombine.low %v1091_v25, %v1095_v26 }
 0x207   : > { %2684 = vmatpush1.bf16.msra.mxu1 %v3979_v39  ;;  %v4035_v39 = vcombine.low %v924_v40, %v928_v41  ;;  %v4083_v40 = vcombine.low %v972_v28, %v976_v29 }
 0x208   : > { %2641 = vmatpush1.bf16.msra.mxu0 %v4105_v55  ;;  %2685 = vmatprep.subr.bf16.mxu1 %v3988_v56  ;;  %v4161_v55 = vcombine.low %v1051_v42, %v1055_v44  ;;  %v4044_v56 = vcombine.high %v932_v51, %v936_v52  ;;  %v988_v42 = vld [vmem:[#allocation4 + $0x498] sm:$0xff] }
 0x209   : > { %2642 = vmatprep.subr.bf16.mxu0 %v4114_v43  ;;  %v4170_v43 = vcombine.high %v1059_v53, %v1063_v54  ;;  %v992_v44 = vld [vmem:[#allocation4 + $0x4b8] sm:$0xff] }
 0x20b   : > { %2686 = vmatpush1.bf16.msra.mxu1 %v3987_v58  ;;  %v4043_v58 = vcombine.low %v932_v51, %v936_v52  ;;  %v996_v51 = vld [vmem:[#allocation4 + $0x4d8] sm:$0xff] }
 0x20c   : > { %2643 = vmatpush1.bf16.msra.mxu0 %v4113_v59  ;;  %2687 = vmatprep.subr.bf16.mxu1 %v3996_v60  ;;  %v4169_v59 = vcombine.low %v1059_v53, %v1063_v54  ;;  %v4052_v60 = vcombine.high %v940_v47, %v944_v48  ;;  %v1000_v52 = vld [vmem:[#allocation4 + $0x4f8] sm:$0xff]  ;;  %v4534_v54 = vld [vmem:[#allocation6 + $0x24] ss:$8 sps:$4 sm:$0xff]  }
 0x20d   : > { %2644 = vmatprep.subr.bf16.mxu0 %v4122_v61  ;;  %v4178_v61 = vcombine.high %v1067_v57, %v1071_v20  ;;  %v4529_v53 = vld [vmem:[#allocation6 + $0x10] ss:$8 sps:$4 sm:$0xff]  }
 0x20f   : > { %2688 = vmatpush1.bf16.msra.mxu1 %v3995_v4  ;;  %v4051_v4 = vcombine.low %v940_v47, %v944_v48  ;;  %v4537_v47 = vld [vmem:[#allocation6 + $0x34] ss:$8 sps:$4 sm:$0xff]  }
 0x210   : > { %2645 = vmatpush1.bf16.msra.mxu0 %v4121_v5  ;;  %2689 = vmatprep.subr.bf16.mxu1 %v4004_v6  ;;  %v4177_v5 = vcombine.low %v1067_v57, %v1071_v20  ;;  %v4060_v6 = vcombine.high %v948_v63, %v952_v0  ;;  %v1012_v57 = vld [vmem:[#allocation4 + $0x558] sm:$0xff] }
 0x211   : > { %2646 = vmatprep.subr.bf16.mxu0 %v4130_v7  ;;  %v4186_v7 = vcombine.high %v1075_v1, %v1079_v3  ;;  %v1016_v20 = vld [vmem:[#allocation4 + $0x578] sm:$0xff] }
 0x213   : > { %2690 = vmatpush1.bf16.msra.mxu1 %v4003_v12  ;;  %v4059_v12 = vcombine.low %v948_v63, %v952_v0  ;;  %v1020_v63 = vld [vmem:[#allocation4 + $0x598] sm:$0xff] }
 0x214   : > { %2647 = vmatpush1.bf16.msra.mxu0 %v4129_v16  ;;  %2691 = vmatprep.subr.bf16.mxu1 %v4012_v17  ;;  %v4185_v16 = vcombine.low %v1075_v1, %v1079_v3  ;;  %v4068_v17 = vcombine.high %v956_v8, %v960_v9  ;;  %v1024_v0 = vld [vmem:[#allocation4 + $0x5b8] sm:$0xff]  ;;  %v4538_v1 = vld [vmem:[#allocation6 + $0x40] ss:$8 sps:$4 sm:$0xff]  }
 0x215   : > { %2648 = vmatprep.subr.bf16.mxu0 %v4138_v22  ;;  %v4194_v22 = vcombine.high %v1083_v10, %v1087_v11  ;;  %v4543_v3 = vld [vmem:[#allocation6 + $0x54] ss:$8 sps:$4 sm:$0xff]  }
 0x217   : > { %2692 = vmatpush1.bf16.msra.mxu1 %v4011_v27  ;;  %v4067_v27 = vcombine.low %v956_v8, %v960_v9  ;;  %v1032_v8 = vld [vmem:[#allocation4 + $0x5f8] sm:$0xff] }
 0x218   : > { %2649 = vmatpush1.bf16.msra.mxu0 %v4137_v13  ;;  %2693 = vmatprep.subr.bf16.mxu1 %v4020_v14  ;;  %v4193_v13 = vcombine.low %v1083_v10, %v1087_v11  ;;  %v4076_v14 = vcombine.high %v964_v23, %v968_v24  ;;  %v4541_v9 = vld [vmem:[#allocation6 + $0x50] ss:$8 sps:$4 sm:$0xff]   ;;  %v4546_v11 = vld [vmem:[#allocation6 + $0x64] ss:$8 sps:$4 sm:$0xff]  }
 0x219   : > { %2650 = vmatprep.subr.bf16.mxu0 %v4146_v15  ;;  %v4202_v15 = vcombine.high %v1091_v25, %v1095_v26  ;;  %v1036_v23 = vld [vmem:[#allocation4 + $0x618] sm:$0xff]  ;;  %v4544_v25 = vld [vmem:[#allocation6 + $0x60] ss:$8 sps:$4 sm:$0xff]  }
 0x21a   : > { %v1040_v24 = vld [vmem:[#allocation4 + $0x638] sm:$0xff] }
 0x21b   : > { %2694 = vmatpush1.bf16.msra.mxu1 %v4019_v34  ;;  %v4084_v34 = vcombine.high %v972_v28, %v976_v29  ;;  %v4549_v26 = vld [vmem:[#allocation6 + $0x74] ss:$8 sps:$4 sm:$0xff]   ;;  %v4547_v28 = vld [vmem:[#allocation6 + $0x70] ss:$8 sps:$4 sm:$0xff]   ;;  %v4552_v29 = vld [vmem:[#allocation6 + $0x84] ss:$8 sps:$4 sm:$0xff]  }
 0x21c   : > { %2651 = vmatpush1.bf16.msra.mxu0 %v4145_v35  ;;  %2695 = vmatprep.subr.bf16.mxu1 %v4028_v36  ;;  %v980_v35 = vld [vmem:[#allocation4 + $0x458] sm:$0xff] }
 0x21d   : > { %2652 = vmatprep.subr.bf16.mxu0 %v4154_v37  ;;  %v984_v36 = vld [vmem:[#allocation4 + $0x478] sm:$0xff]  ;;  %v4528_v37 = vld [vmem:[#allocation6 + $0x4] ss:$8 sps:$4 sm:$0xff]  }
 0x21e   : > { %v4092_v41 = vcombine.high %v980_v35, %v984_v36 }
 0x21f   : > { %2696 = vmatpush1.bf16.msra.mxu1 %v4027_v45  ;;  %v4526_v45 = vld [vmem:[#allocation6] ss:$8 sps:$4 sm:$0xff]  }
 0x220   : > { %2653 = vmatpush1.bf16.msra.mxu0 %v4153_v46  ;;  %2697 = vmatprep.subr.bf16.mxu1 %v4036_v49  ;;  %v4531_v46 = vld [vmem:[#allocation6 + $0x14] ss:$8 sps:$4 sm:$0xff]   ;;  %v4091_v49 = vcombine.low %v980_v35, %v984_v36  ;;  %v4550_v36 = vld [vmem:[#allocation6 + $0x80] ss:$8 sps:$4 sm:$0xff]  }
 0x221   : > { %2654 = vmatprep.subr.bf16.mxu0 %v4162_v50  ;;  %v4100_v50 = vcombine.high %v988_v42, %v992_v44  ;;  %v1056_v35 = vld [vmem:[#allocation4 + $0x6b8] sm:$0xff] }
 0x223   : > { %2698 = vmatpush1.bf16.msra.mxu1 %v4035_v39  ;;  %v4099_v39 = vcombine.low %v988_v42, %v992_v44  ;;  %v1060_v42 = vld [vmem:[#allocation4 + $0x6d8] sm:$0xff] }
 0x224   : > { %2655 = vmatpush1.bf16.msra.mxu0 %v4161_v55  ;;  %2699 = vmatprep.subr.bf16.mxu1 %v4044_v56  ;;  %v4108_v55 = vcombine.high %v996_v51, %v1000_v52  ;;  %v1008_v56 = vld [vmem:[#allocation4 + $0x538] sm:$0xff] }
 0x225   : > { %2656 = vmatprep.subr.bf16.mxu0 %v4170_v43  ;;  %v4532_v43 = vld [vmem:[#allocation6 + $0x20] ss:$8 sps:$4 sm:$0xff]   ;;  %v1064_v44 = vld [vmem:[#allocation4 + $0x6f8] sm:$0xff] }
 0x227   : > { %2700 = vmatpush1.bf16.msra.mxu1 %v4043_v58  ;;  %v4535_v58 = vld [vmem:[#allocation6 + $0x30] ss:$8 sps:$4 sm:$0xff]  }
 0x228   : > { %2657 = vmatpush1.bf16.msra.mxu0 %v4169_v59  ;;  %2701 = vmatprep.subr.bf16.mxu1 %v4052_v60  ;;  %v4540_v59 = vld [vmem:[#allocation6 + $0x44] ss:$8 sps:$4 sm:$0xff]  }
 0x229   : > { %2658 = vmatprep.subr.bf16.mxu0 %v4178_v61  ;;  %v4124_v61 = vcombine.high %v1012_v57, %v1016_v20 }
 0x22b   : > { %2702 = vmatpush1.bf16.msra.mxu1 %v4051_v4  ;;  %v4123_v4 = vcombine.low %v1012_v57, %v1016_v20  ;;  %v1084_v57 = vld [vmem:[#allocation4 + $0x798] sm:$0xff] }
 0x22c   : > { %2659 = vmatpush1.bf16.msra.mxu0 %v4177_v5  ;;  %2703 = vmatprep.subr.bf16.mxu1 %v4060_v6  ;;  %v4132_v5 = vcombine.high %v1020_v63, %v1024_v0  ;;  %v1088_v20 = vld [vmem:[#allocation4 + $0x7b8] sm:$0xff] }
 0x22d   : > { %2660 = vmatprep.subr.bf16.mxu0 %v4186_v7  ;;  %v1028_v7 = vld [vmem:[#allocation4 + $0x5d8] sm:$0xff] }
 0x22f   : > { %2704 = vmatpush1.bf16.msra.mxu1 %v4059_v12 }
 0x230   : > { %2661 = vmatpush1.bf16.msra.mxu0 %v4185_v16  ;;  %2705 = vmatprep.subr.bf16.mxu1 %v4068_v17  ;;  %v4131_v16 = vcombine.low %v1020_v63, %v1024_v0  ;;  %v1092_v63 = vld [vmem:[#allocation4 + $0x7d8] sm:$0xff] }
 0x231   : > { %2662 = vmatprep.subr.bf16.mxu0 %v4194_v22  ;;  %v4140_v22 = vcombine.high %v1028_v7, %v1032_v8  ;;  %v1096_v0 = vld [vmem:[#allocation4 + $0x7f8] sm:$0xff] }
 0x233   : > { %2706 = vmatpush1.bf16.msra.mxu1 %v4067_v27  ;;  %v4139_v27 = vcombine.low %v1028_v7, %v1032_v8  ;;  %v4568_v7 = vld [vmem:[#allocation6 + $0xe0] ss:$8 sps:$4 sm:$0xff]   ;;  %v4573_v8 = vld [vmem:[#allocation6 + $0xf4] ss:$8 sps:$4 sm:$0xff]  }
 0x234   : > { %2663 = vmatpush1.bf16.msra.mxu0 %v4193_v13  ;;  %2707 = vmatprep.subr.bf16.mxu1 %v4076_v14  ;;  %v4148_v13 = vcombine.high %v1036_v23, %v1040_v24  ;;  %v1044_v14 = vld [vmem:[#allocation4 + $0x658] sm:$0xff] }
 0x235   : > { %2664 = vmatprep.subr.bf16.mxu0 %v4202_v15  ;;  %v1048_v15 = vld [vmem:[#allocation4 + $0x678] sm:$0xff] }
 0x237   : > { %2708 = vmatpush1.bf16.msra.mxu1 %v4075_v30  ;;  %v4147_v30 = vcombine.low %v1036_v23, %v1040_v24 }
 0x238   : > { %2665 = vmatpush1.bf16.msra.mxu0 %v4201_v31  ;;  %2720 = vmatprep.subr.bf16.mxu1 %v4084_v34  ;;  %v4156_v31 = vcombine.high %v1044_v14, %v1048_v15  ;;  %v1052_v34 = vld [vmem:[#allocation4 + $0x698] sm:$0xff] }
 0x239   : > { %3567 = vmatprep.subr.bf16.mxu0 %v4528_v37  ;;  %v4555_v37 = vld [vmem:[#allocation6 + $0x94] ss:$8 sps:$4 sm:$0xff]  }
 0x23a   : > { %2710 = vmatmul.mubr.bf16.vlgmr.msra.gmra.mrb[16].mxu1 %v5045_v38  ;;  %v1004_v38 = vld [vmem:[#allocation4 + $0x518] sm:$0xff] }
 0x23b   : > { %2667 = vmatmul.mubr.bf16.vlgmr.msra.gmra.mrb[4].mxu0 %v5063_v62  ;;  %2721 = vmatpush1.bf16.msra.mxu1 %v4083_v40  ;;  %v4116_v48 = vcombine.high %v1004_v38, %v1008_v56  ;;  %v4115_v60 = vcombine.low %v1004_v38, %v1008_v56  ;;  %v4155_v40 = vcombine.low %v1044_v14, %v1048_v15  ;;  %v1076_v38 = vld [vmem:[#allocation4 + $0x758] sm:$0xff] }
 0x23c   : > { %2752 = vmatprep.mubr.bf16.mxu1 %v5065_v2  ;;  %2722 = vmatprep.subr.bf16.mxu1 %v4092_v41  ;;  %v4107_v2 = vcombine.low %v996_v51, %v1000_v52  ;;  %v4164_v41 = vcombine.high %v1052_v34, %v1056_v35  ;;  %v1068_v51 = vld [vmem:[#allocation4 + $0x718] sm:$0xff] }
 0x23d   : > { %3568 = vmatpush1.bf16.msra.mxu0 %v4526_v45  ;;  %v4553_v45 = vld [vmem:[#allocation6 + $0x90] ss:$8 sps:$4 sm:$0xff]  }
 0x23e   : > { %3569 = vmatprep.subr.bf16.mxu0 %v4531_v46  ;;  %v4558_v46 = vld [vmem:[#allocation6 + $0xa4] ss:$8 sps:$4 sm:$0xff]   ;;  %v1072_v52 = vld [vmem:[#allocation4 + $0x738] sm:$0xff] }
 0x23f   : > { %2723 = vmatpush1.bf16.msra.mxu1 %v4091_v49  ;;  %v4163_v49 = vcombine.low %v1052_v34, %v1056_v35  ;;  %v1080_v56 = vld [vmem:[#allocation4 + $0x778] sm:$0xff] }
 0x240   : > { %2724 = vmatprep.subr.bf16.mxu1 %v4100_v50  ;;  %v4172_v50 = vcombine.high %v1060_v42, %v1064_v44 }
 0x241   : > { %3570 = vmatpush1.bf16.msra.mxu0 %v4529_v53  ;;  %v4556_v53 = vld [vmem:[#allocation6 + $0xa0] ss:$8 sps:$4 sm:$0xff]  }
 0x242   : > { %3571 = vmatprep.subr.bf16.mxu0 %v4534_v54  ;;  %v4561_v54 = vld [vmem:[#allocation6 + $0xb4] ss:$8 sps:$4 sm:$0xff]  }
 0x243   : > { %2725 = vmatpush1.bf16.msra.mxu1 %v4099_v39  ;;  %v4171_v39 = vcombine.low %v1060_v42, %v1064_v44  ;;  %v4574_v42 = vld [vmem:[#allocation6 + $0x100] ss:$8 sps:$4 sm:$0xff]   ;;  %v4582_v44 = vld [vmem:[#allocation6 + $0x124] ss:$8 sps:$4 sm:$0xff]  }
 0x244   : > { %2726 = vmatprep.subr.bf16.mxu1 %v4108_v55  ;;  %v4180_v55 = vcombine.high %v1068_v51, %v1072_v52 }
 0x245   : > { %3572 = vmatpush1.bf16.msra.mxu0 %v4532_v43  ;;  %v4559_v43 = vld [vmem:[#allocation6 + $0xb0] ss:$8 sps:$4 sm:$0xff]  }
 0x246   : > { %3573 = vmatprep.subr.bf16.mxu0 %v4537_v47  ;;  %v4564_v47 = vld [vmem:[#allocation6 + $0xc4] ss:$8 sps:$4 sm:$0xff]  }
 0x247   : > { %2727 = vmatpush1.bf16.msra.mxu1 %v4107_v2  ;;  %v4179_v2 = vcombine.low %v1068_v51, %v1072_v52  ;;  %v4591_v51 = vld [vmem:[#allocation6 + $0x154] ss:$8 sps:$4 sm:$0xff]   ;;  %v4589_v52 = vld [vmem:[#allocation6 + $0x150] ss:$8 sps:$4 sm:$0xff]  }
 0x248   : > { %2728 = vmatprep.subr.bf16.mxu1 %v4116_v48  ;;  %v4188_v48 = vcombine.high %v1076_v38, %v1080_v56 }
 0x249   : > { %3574 = vmatpush1.bf16.msra.mxu0 %v4535_v58  ;;  %v4562_v58 = vld [vmem:[#allocation6 + $0xc0] ss:$8 sps:$4 sm:$0xff]  }
 0x24a   : > { %3575 = vmatprep.subr.bf16.mxu0 %v4540_v59  ;;  %v4567_v59 = vld [vmem:[#allocation6 + $0xd4] ss:$8 sps:$4 sm:$0xff]  }
 0x24b   : > { %2729 = vmatpush1.bf16.msra.mxu1 %v4115_v60  ;;  %v4187_v60 = vcombine.low %v1076_v38, %v1080_v56  ;;  %v4600_v38 = vld [vmem:[#allocation6 + $0x184] ss:$8 sps:$4 sm:$0xff]   ;;  %v4598_v56 = vld [vmem:[#allocation6 + $0x180] ss:$8 sps:$4 sm:$0xff]  }
 0x24c   : > { %2730 = vmatprep.subr.bf16.mxu1 %v4124_v61  ;;  %v4196_v61 = vcombine.high %v1084_v57, %v1088_v20 }
 0x24d   : > { %v5082_v6 = vpop.f32.mrb[8].mxu1  ;;  %3576 = vmatpush1.bf16.msra.mxu0 %v4538_v1  ;;  %v4565_v1 = vld [vmem:[#allocation6 + $0xd0] ss:$8 sps:$4 sm:$0xff]  }
 0x24e   : > { %v5084_v10 = vpop.f32.mrb[9].mxu1  ;;  %3577 = vmatprep.subr.bf16.mxu0 %v4543_v3  ;;  %v4570_v3 = vld [vmem:[#allocation6 + $0xe4] ss:$8 sps:$4 sm:$0xff]  }
 0x24f   : > { %2731 = vmatpush1.bf16.msra.mxu1 %v4123_v4  ;;  %v5086_v12 = vpop.f32.mrb[10].mxu1  ;;  %v4195_v4 = vcombine.low %v1084_v57, %v1088_v20  ;;  %v4609_v57 = vld [vmem:[#allocation6 + $0x1b4] ss:$8 sps:$4 sm:$0xff]   ;;  %v4607_v20 = vld [vmem:[#allocation6 + $0x1b0] ss:$8 sps:$4 sm:$0xff]  }
 0x250   : > { %v5088_v17 = vpop.f32.mrb[11].mxu1  ;;  %2732 = vmatprep.subr.bf16.mxu1 %v4132_v5  ;;  %v4204_v5 = vcombine.high %v1092_v63, %v1096_v0 }
 0x251   : > { %3578 = vmatpush1.bf16.msra.mxu0 %v4541_v9  ;;  %v4203_v9 = vcombine.low %v1092_v63, %v1096_v0  ;;  %v4618_v0 = vld [vmem:[#allocation6 + $0x1e4] ss:$8 sps:$4 sm:$0xff]  }
 0x252   : > { %3579 = vmatprep.subr.bf16.mxu0 %v4546_v11  ;;  %v4571_v11 = vld [vmem:[#allocation6 + $0xf0] ss:$8 sps:$4 sm:$0xff]  }
 0x253   : > { %2733 = vmatpush1.bf16.msra.mxu1 %v4131_v16  ;;  %v4576_v16 = vld [vmem:[#allocation6 + $0x104] ss:$8 sps:$4 sm:$0xff]  }
 0x254   : > { %2734 = vmatprep.subr.bf16.mxu1 %v4140_v22  ;;  %v5094_v22 = vld [vmem:[%s5135_s4] sm:$0xff] }
 0x255   : > { %3580 = vmatpush1.bf16.msra.mxu0 %v4544_v25  ;;  %v1102_v23 = vrot.slane %v5094_v22, %v5031_v19  ;;  %v1106_v24 = vrot.slane %v5094_v22, %v5039_v21  ;;  %v1110_v63 = vrot.slane %v5094_v22, %v413_v32 }
 0x256   : > { %3581 = vmatprep.subr.bf16.mxu0 %v4549_v26 }
 0x257   : > { %2735 = vmatpush1.bf16.msra.mxu1 %v4139_v27  ;;  %v2454_v25 = vadd.f32 %v5082_v6, %v1102_v23  ;;  %v2456_v26 = vadd.f32 %v5084_v10, %v1106_v24  ;;  %v2460_v15 = vadd.f32 %v5088_v17, %v1106_v24  ;;  %v4579_v10 = vld [vmem:[#allocation6 + $0x114] ss:$8 sps:$4 sm:$0xff]   ;;  %v4580_v17 = vld [vmem:[#allocation6 + $0x120] ss:$8 sps:$4 sm:$0xff]  }
 0x258   : > { %2736 = vmatprep.subr.bf16.mxu1 %v4148_v13  ;;  %v2458_v13 = vadd.f32 %v5086_v12, %v1102_v23  ;;  %v4577_v12 = vld [vmem:[#allocation6 + $0x110] ss:$8 sps:$4 sm:$0xff]  }
 0x259   : > { %3582 = vmatpush1.bf16.msra.mxu0 %v4547_v28 }
 0x25a   : > { %3583 = vmatprep.subr.bf16.mxu0 %v4552_v29 }
 0x25b   : > { %2737 = vmatpush1.bf16.msra.mxu1 %v4147_v30 }
 0x25c   : > { %2738 = vmatprep.subr.bf16.mxu1 %v4156_v31 }
 0x25d   : > { %3584 = vmatpush1.bf16.msra.mxu0 %v4550_v36 }
 0x25e   : > { %3585 = vmatprep.subr.bf16.mxu0 %v4555_v37 }
 0x25f   : > { %2739 = vmatpush1.bf16.msra.mxu1 %v4155_v40 }
 0x260   : > { %2740 = vmatprep.subr.bf16.mxu1 %v4164_v41 }
 0x261   : > { %3586 = vmatpush1.bf16.msra.mxu0 %v4553_v45  ;;  %v4585_v45 = vld [vmem:[#allocation6 + $0x134] ss:$8 sps:$4 sm:$0xff]  }
 0x262   : > { %3587 = vmatprep.subr.bf16.mxu0 %v4558_v46  ;;  %v4583_v46 = vld [vmem:[#allocation6 + $0x130] ss:$8 sps:$4 sm:$0xff]  }
 0x263   : > { %2741 = vmatpush1.bf16.msra.mxu1 %v4163_v49  ;;  %v4588_v49 = vld [vmem:[#allocation6 + $0x144] ss:$8 sps:$4 sm:$0xff]  }
 0x264   : > { %2742 = vmatprep.subr.bf16.mxu1 %v4172_v50  ;;  %v4586_v50 = vld [vmem:[#allocation6 + $0x140] ss:$8 sps:$4 sm:$0xff]  }
 0x265   : > { %3588 = vmatpush1.bf16.msra.mxu0 %v4556_v53  ;;  %v4594_v53 = vld [vmem:[#allocation6 + $0x164] ss:$8 sps:$4 sm:$0xff]  }
 0x266   : > { %3589 = vmatprep.subr.bf16.mxu0 %v4561_v54  ;;  %v4592_v54 = vld [vmem:[#allocation6 + $0x160] ss:$8 sps:$4 sm:$0xff]  }
 0x267   : > { %2743 = vmatpush1.bf16.msra.mxu1 %v4171_v39  ;;  %v4597_v39 = vld [vmem:[#allocation6 + $0x174] ss:$8 sps:$4 sm:$0xff]  }
 0x268   : > { %2744 = vmatprep.subr.bf16.mxu1 %v4180_v55  ;;  %v4595_v55 = vld [vmem:[#allocation6 + $0x170] ss:$8 sps:$4 sm:$0xff]  }
 0x269   : > { %3590 = vmatpush1.bf16.msra.mxu0 %v4559_v43  ;;  %v4603_v43 = vld [vmem:[#allocation6 + $0x194] ss:$8 sps:$4 sm:$0xff]  }
 0x26a   : > { %3591 = vmatprep.subr.bf16.mxu0 %v4564_v47  ;;  %v4601_v47 = vld [vmem:[#allocation6 + $0x190] ss:$8 sps:$4 sm:$0xff]  }
 0x26b   : > { %2745 = vmatpush1.bf16.msra.mxu1 %v4179_v2  ;;  %v4606_v2 = vld [vmem:[#allocation6 + $0x1a4] ss:$8 sps:$4 sm:$0xff]  }
 0x26c   : > { %2746 = vmatprep.subr.bf16.mxu1 %v4188_v48  ;;  %v4604_v48 = vld [vmem:[#allocation6 + $0x1a0] ss:$8 sps:$4 sm:$0xff]  }
 0x26d   : > { %3592 = vmatpush1.bf16.msra.mxu0 %v4562_v58  ;;  %v4612_v58 = vld [vmem:[#allocation6 + $0x1c4] ss:$8 sps:$4 sm:$0xff]  }
 0x26e   : > { %3593 = vmatprep.subr.bf16.mxu0 %v4567_v59  ;;  %v4610_v59 = vld [vmem:[#allocation6 + $0x1c0] ss:$8 sps:$4 sm:$0xff]  }
 0x26f   : > { %2747 = vmatpush1.bf16.msra.mxu1 %v4187_v60  ;;  %v4615_v60 = vld [vmem:[#allocation6 + $0x1d4] ss:$8 sps:$4 sm:$0xff]  }
 0x270   : > { %2748 = vmatprep.subr.bf16.mxu1 %v4196_v61  ;;  %v4613_v61 = vld [vmem:[#allocation6 + $0x1d0] ss:$8 sps:$4 sm:$0xff]  }
 0x271   : > { %3594 = vmatpush1.bf16.msra.mxu0 %v4565_v1  ;;  %v1114_v1 = vrot.slane %v5094_v22, %v417_v33 }
 0x272   : > { %3595 = vmatprep.subr.bf16.mxu0 %v4570_v3 }
 0x273   : > { %2749 = vmatpush1.bf16.msra.mxu1 %v4195_v4  ;;  %v4616_v4 = vld [vmem:[#allocation6 + $0x1e0] ss:$8 sps:$4 sm:$0xff]  }
 0x274   : > { %2750 = vmatprep.subr.bf16.mxu1 %v4204_v5 }
 0x275   : > { %3596 = vmatpush1.bf16.msra.mxu0 %v4568_v7 }
 0x276   : > { %3597 = vmatprep.subr.bf16.mxu0 %v4573_v8  ;;  %v4621_v8 = vld [vmem:[#allocation6 + $0x1f4] ss:$8 sps:$4 sm:$0xff]  }
 0x277   : > { %2751 = vmatpush1.bf16.msra.mxu1 %v4203_v9 }
 0x279   : > { %3598 = vmatpush1.bf16.msra.mxu0 %v4571_v11 }
 0x27a   : > { %2753 = vmatmul.mubr.bf16.vlgmr.msra.gmra.mrb[16].mxu1 %v5063_v62  ;;  %3610 = vmatprep.subr.bf16.mxu0 %v4576_v16 }
 0x28d   : > { %v2496_v27 = vpop.f32.mrb[0].mxu0 }
 0x28e   : > { %v2497_v62 = vadd.f32 %v2496_v27, %v2454_v25  ;;  %v2498_v14 = vpop.f32.mrb[1].mxu0  ;;  %v4619_v25 = vld [vmem:[#allocation6 + $0x1f0] ss:$8 sps:$4 sm:$0xff]   ;;  %v4624_v27 = vld [vmem:[#allocation6 + $0x204] ss:$8 sps:$4 sm:$0xff]  }
 0x28f   : > { %v2499_v28 = vadd.f32 %v2498_v14, %v2456_v26  ;;  %v2500_v29 = vpop.f32.mrb[2].mxu0 }
 0x290   : > { %v2501_v30 = vadd.f32 %v2500_v29, %v2458_v13  ;;  %v2502_v31 = vpop.f32.mrb[3].mxu0  ;;  %v2763_v35 = vmax.f32 %v2497_v62, 0.0  ;;  %v4625_v29 = vld [vmem:[#allocation6 + $0x210] ss:$8 sps:$4 sm:$0xff]  }
 0x291   : > { %v2503_v34 = vadd.f32 %v2502_v31, %v2460_v15  ;;  %v2764_v37 = vmax.f32 %v2499_v28, 0.0  ;;  %v4622_v15 = vld [vmem:[#allocation6 + $0x200] ss:$8 sps:$4 sm:$0xff]   ;;  %v4627_v28 = vld [vmem:[#allocation6 + $0x214] ss:$8 sps:$4 sm:$0xff]  }
 0x292   : > { %v2771_v36 = vmax.f32 %v2501_v30, 0.0  ;;  %v4630_v30 = vld [vmem:[#allocation6 + $0x224] ss:$8 sps:$4 sm:$0xff]   ;;  %v4628_v31 = vld [vmem:[#allocation6 + $0x220] ss:$8 sps:$4 sm:$0xff]  }
 0x293   : > { %v2772_v40 = vmax.f32 %v2503_v34, 0.0  ;;  %v4633_v34 = vld [vmem:[#allocation6 + $0x234] ss:$8 sps:$4 sm:$0xff]  }
 0x294   : > { %v2779_v41 = vpack.c.bf16 %v2771_v36, %v2763_v35  ;;  %v4631_v35 = vld [vmem:[#allocation6 + $0x230] ss:$8 sps:$4 sm:$0xff]   ;;  %v4636_v36 = vld [vmem:[#allocation6 + $0x244] ss:$8 sps:$4 sm:$0xff]  }
 0x295   : > { %v2780_v6 = vpack.c.bf16 %v2772_v40, %v2764_v37  ;;  %v4634_v37 = vld [vmem:[#allocation6 + $0x240] ss:$8 sps:$4 sm:$0xff]   ;;  %v4639_v40 = vld [vmem:[#allocation6 + $0x254] ss:$8 sps:$4 sm:$0xff]  }
 0x297   : > { %3599 = vmatprep.mubr.bf16.mxu0 %v2780_v6  ;;  %v4642_v6 = vld [vmem:[#allocation6 + $0x264] ss:$8 sps:$4 sm:$0xff]  }
 0x298   : > { %3600 = vmatmul.mubr.bf16.vlgmr.msra.gmra.mrb[8].mxu0 %v2779_v41  ;;  %v4637_v41 = vld [vmem:[#allocation6 + $0x250] ss:$8 sps:$4 sm:$0xff]  }
 0x299   : > { %3611 = vmatpush1.bf16.msra.mxu0 %v4574_v42  ;;  %v4640_v42 = vld [vmem:[#allocation6 + $0x260] ss:$8 sps:$4 sm:$0xff]  }
 0x29a   : > { %3612 = vmatprep.subr.bf16.mxu0 %v4579_v10  ;;  %v4645_v10 = vld [vmem:[#allocation6 + $0x274] ss:$8 sps:$4 sm:$0xff]  }
 0x29d   : > { %3613 = vmatpush1.bf16.msra.mxu0 %v4577_v12  ;;  %v4643_v12 = vld [vmem:[#allocation6 + $0x270] ss:$8 sps:$4 sm:$0xff]  }
 0x29e   : > { %3614 = vmatprep.subr.bf16.mxu0 %v4582_v44  ;;  %v4648_v44 = vld [vmem:[#allocation6 + $0x284] ss:$8 sps:$4 sm:$0xff]  }
 0x2a1   : > { %3615 = vmatpush1.bf16.msra.mxu0 %v4580_v17  ;;  %v4646_v17 = vld [vmem:[#allocation6 + $0x280] ss:$8 sps:$4 sm:$0xff]  }
 0x2a2   : > { %3616 = vmatprep.subr.bf16.mxu0 %v4585_v45  ;;  %v4651_v45 = vld [vmem:[#allocation6 + $0x294] ss:$8 sps:$4 sm:$0xff]  }
 0x2a5   : > { %3617 = vmatpush1.bf16.msra.mxu0 %v4583_v46  ;;  %v4649_v46 = vld [vmem:[#allocation6 + $0x290] ss:$8 sps:$4 sm:$0xff]  }
 0x2a6   : > { %3618 = vmatprep.subr.bf16.mxu0 %v4588_v49  ;;  %v4654_v49 = vld [vmem:[#allocation6 + $0x2a4] ss:$8 sps:$4 sm:$0xff]  }
 0x2a9   : > { %3619 = vmatpush1.bf16.msra.mxu0 %v4586_v50  ;;  %v4652_v50 = vld [vmem:[#allocation6 + $0x2a0] ss:$8 sps:$4 sm:$0xff]  }
 0x2aa   : > { %3620 = vmatprep.subr.bf16.mxu0 %v4591_v51  ;;  %v4657_v51 = vld [vmem:[#allocation6 + $0x2b4] ss:$8 sps:$4 sm:$0xff]  }
 0x2ad   : > { %3621 = vmatpush1.bf16.msra.mxu0 %v4589_v52  ;;  %v4655_v52 = vld [vmem:[#allocation6 + $0x2b0] ss:$8 sps:$4 sm:$0xff]  }
 0x2ae   : > { %3622 = vmatprep.subr.bf16.mxu0 %v4594_v53  ;;  %v4660_v53 = vld [vmem:[#allocation6 + $0x2c4] ss:$8 sps:$4 sm:$0xff]  }
 0x2b1   : > { %3623 = vmatpush1.bf16.msra.mxu0 %v4592_v54  ;;  %v4658_v54 = vld [vmem:[#allocation6 + $0x2c0] ss:$8 sps:$4 sm:$0xff]  }
 0x2b2   : > { %3624 = vmatprep.subr.bf16.mxu0 %v4597_v39  ;;  %v4663_v39 = vld [vmem:[#allocation6 + $0x2d4] ss:$8 sps:$4 sm:$0xff]  }
 0x2b5   : > { %3625 = vmatpush1.bf16.msra.mxu0 %v4595_v55  ;;  %v1117_v55 = vsub.s32 4, %v5028_v18 }
 0x2b6   : > { %3626 = vmatprep.subr.bf16.mxu0 %v4600_v38  ;;  %v1121_v38 = vsub.s32 5, %v5028_v18 }
 0x2b9   : > { %3627 = vmatpush1.bf16.msra.mxu0 %v4598_v56  ;;  %v4661_v56 = vld [vmem:[#allocation6 + $0x2d0] ss:$8 sps:$4 sm:$0xff]  }
 0x2ba   : > { %3628 = vmatprep.subr.bf16.mxu0 %v4603_v43  ;;  %v4666_v43 = vld [vmem:[#allocation6 + $0x2e4] ss:$8 sps:$4 sm:$0xff]  }
 0x2bd   : > { %3629 = vmatpush1.bf16.msra.mxu0 %v4601_v47  ;;  %v1118_v47 = vrot.slane %v5094_v22, %v1117_v55 }
 0x2be   : > { %3630 = vmatprep.subr.bf16.mxu0 %v4606_v2  ;;  %v1122_v2 = vrot.slane %v5094_v22, %v1121_v38 }
 0x2c1   : > { %3631 = vmatpush1.bf16.msra.mxu0 %v4604_v48  ;;  %v4664_v48 = vld [vmem:[#allocation6 + $0x2e0] ss:$8 sps:$4 sm:$0xff]  }
 0x2c2   : > { %3632 = vmatprep.subr.bf16.mxu0 %v4609_v57 }
 0x2c5   : > { %3633 = vmatpush1.bf16.msra.mxu0 %v4607_v20  ;;  %v4669_v20 = vld [vmem:[#allocation6 + $0x2f4] ss:$8 sps:$4 sm:$0xff]  }
 0x2c6   : > { %3634 = vmatprep.subr.bf16.mxu0 %v4612_v58 }
 0x2c9   : > { %3635 = vmatpush1.bf16.msra.mxu0 %v4610_v59 }
 0x2ca   : > { %3636 = vmatprep.subr.bf16.mxu0 %v4615_v60 }
 0x2cd   : > { %v2582_v3 = vpop.f32.mrb[12].mxu1  ;;  %3637 = vmatpush1.bf16.msra.mxu0 %v4613_v61 }
 0x2ce   : > { %v4345_v5 = vadd.f32 %v2582_v3, %v1110_v63  ;;  %v2584_v7 = vpop.f32.mrb[13].mxu1  ;;  %3638 = vmatprep.subr.bf16.mxu0 %v4618_v0 }
 0x2cf   : > { %v4346_v9 = vadd.f32 %v2584_v7, %v1114_v1  ;;  %v2586_v11 = vpop.f32.mrb[14].mxu1 }
 0x2d0   : > { %v4347_v16 = vadd.f32 %v2586_v11, %v1110_v63  ;;  %v2588_v23 = vpop.f32.mrb[15].mxu1  ;;  %v2765_v32 = vmax.f32 %v4345_v5, 0.0 }
 0x2d1   : > { %v4348_v24 = vadd.f32 %v2588_v23, %v1114_v1  ;;  %3639 = vmatpush1.bf16.msra.mxu0 %v4616_v4  ;;  %v2766_v13 = vmax.f32 %v4346_v9, 0.0  ;;  %v4667_v1 = vld [vmem:[#allocation6 + $0x2f0] ss:$8 sps:$4 sm:$0xff]   ;;  %v4672_v4 = vld [vmem:[#allocation6 + $0x304] ss:$8 sps:$4 sm:$0xff]  }
 0x2d2   : > { %v2773_v26 = vmax.f32 %v4347_v16, 0.0  ;;  %3640 = vmatprep.subr.bf16.mxu0 %v4621_v8  ;;  %v4670_v23 = vld [vmem:[#allocation6 + $0x300] ss:$8 sps:$4 sm:$0xff]  }
 0x2d3   : > { %v2774_v33 = vmax.f32 %v4348_v24, 0.0  ;;  %v4675_v24 = vld [vmem:[#allocation6 + $0x314] ss:$8 sps:$4 sm:$0xff]  }
 0x2d4   : > { %v2781_v62 = vpack.c.bf16 %v2773_v26, %v2765_v32  ;;  %v4678_v32 = vld [vmem:[#allocation6 + $0x324] ss:$8 sps:$4 sm:$0xff]   ;;  %v4676_v26 = vld [vmem:[#allocation6 + $0x320] ss:$8 sps:$4 sm:$0xff]  }
 0x2d5   : > { %v2782_v14 = vpack.c.bf16 %v2774_v33, %v2766_v13  ;;  %3641 = vmatpush1.bf16.msra.mxu0 %v4619_v25  ;;  %v4673_v25 = vld [vmem:[#allocation6 + $0x310] ss:$8 sps:$4 sm:$0xff]   ;;  %v4684_v33 = vld [vmem:[#allocation6 + $0x344] ss:$8 sps:$4 sm:$0xff]  }
 0x2d6   : > { %3653 = vmatprep.subr.bf16.mxu0 %v4624_v27  ;;  %v4681_v27 = vld [vmem:[#allocation6 + $0x334] ss:$8 sps:$4 sm:$0xff]   ;;  %v4679_v13 = vld [vmem:[#allocation6 + $0x330] ss:$8 sps:$4 sm:$0xff]  }
 0x2d7   : > { %3642 = vmatprep.mubr.bf16.mxu0 %v2782_v14  ;;  %v4687_v14 = vld [vmem:[#allocation6 + $0x354] ss:$8 sps:$4 sm:$0xff]  }
 0x2d8   : > { %3643 = vmatmul.mubr.bf16.vlgmr.msra.gmra.mrb[8].mxu0 %v2781_v62  ;;  %v4682_v62 = vld [vmem:[#allocation6 + $0x340] ss:$8 sps:$4 sm:$0xff]  }
 0x2d9   : > { %3654 = vmatpush1.bf16.msra.mxu0 %v4622_v15  ;;  %v4685_v15 = vld [vmem:[#allocation6 + $0x350] ss:$8 sps:$4 sm:$0xff]  }
 0x2da   : > { %3655 = vmatprep.subr.bf16.mxu0 %v4627_v28  ;;  %v4690_v28 = vld [vmem:[#allocation6 + $0x364] ss:$8 sps:$4 sm:$0xff]  }
 0x2dd   : > { %3656 = vmatpush1.bf16.msra.mxu0 %v4625_v29  ;;  %v4688_v29 = vld [vmem:[#allocation6 + $0x360] ss:$8 sps:$4 sm:$0xff]  }
 0x2de   : > { %3657 = vmatprep.subr.bf16.mxu0 %v4630_v30  ;;  %v4693_v30 = vld [vmem:[#allocation6 + $0x374] ss:$8 sps:$4 sm:$0xff]  }
 0x2e1   : > { %3658 = vmatpush1.bf16.msra.mxu0 %v4628_v31  ;;  %v4691_v31 = vld [vmem:[#allocation6 + $0x370] ss:$8 sps:$4 sm:$0xff]  }
 0x2e2   : > { %3659 = vmatprep.subr.bf16.mxu0 %v4633_v34  ;;  %v4696_v34 = vld [vmem:[#allocation6 + $0x384] ss:$8 sps:$4 sm:$0xff]  }
 0x2e5   : > { %3660 = vmatpush1.bf16.msra.mxu0 %v4631_v35  ;;  %v4694_v35 = vld [vmem:[#allocation6 + $0x380] ss:$8 sps:$4 sm:$0xff]  }
 0x2e6   : > { %3661 = vmatprep.subr.bf16.mxu0 %v4636_v36  ;;  %v4699_v36 = vld [vmem:[#allocation6 + $0x394] ss:$8 sps:$4 sm:$0xff]  }
 0x2e9   : > { %3662 = vmatpush1.bf16.msra.mxu0 %v4634_v37  ;;  %v4697_v37 = vld [vmem:[#allocation6 + $0x390] ss:$8 sps:$4 sm:$0xff]  }
 0x2ea   : > { %3663 = vmatprep.subr.bf16.mxu0 %v4639_v40  ;;  %v4702_v40 = vld [vmem:[#allocation6 + $0x3a4] ss:$8 sps:$4 sm:$0xff]  }
 0x2ed   : > { %3664 = vmatpush1.bf16.msra.mxu0 %v4637_v41  ;;  %v4700_v41 = vld [vmem:[#allocation6 + $0x3a0] ss:$8 sps:$4 sm:$0xff]  }
 0x2ee   : > { %3665 = vmatprep.subr.bf16.mxu0 %v4642_v6  ;;  %v4705_v6 = vld [vmem:[#allocation6 + $0x3b4] ss:$8 sps:$4 sm:$0xff]  }
 0x2f1   : > { %3666 = vmatpush1.bf16.msra.mxu0 %v4640_v42  ;;  %v4703_v42 = vld [vmem:[#allocation6 + $0x3b0] ss:$8 sps:$4 sm:$0xff]  }
 0x2f2   : > { %3667 = vmatprep.subr.bf16.mxu0 %v4645_v10  ;;  %v4708_v10 = vld [vmem:[#allocation6 + $0x3c4] ss:$8 sps:$4 sm:$0xff]  }
 0x2f5   : > { %3668 = vmatpush1.bf16.msra.mxu0 %v4643_v12  ;;  %v4706_v12 = vld [vmem:[#allocation6 + $0x3c0] ss:$8 sps:$4 sm:$0xff]  }
 0x2f6   : > { %3669 = vmatprep.subr.bf16.mxu0 %v4648_v44  ;;  %v1125_v44 = vsub.s32 6, %v5028_v18 }
 0x2f9   : > { %3670 = vmatpush1.bf16.msra.mxu0 %v4646_v17  ;;  %v4711_v17 = vld [vmem:[#allocation6 + $0x3d4] ss:$8 sps:$4 sm:$0xff]  }
 0x2fa   : > { %3671 = vmatprep.subr.bf16.mxu0 %v4651_v45  ;;  %v1129_v45 = vsub.s32 7, %v5028_v18 }
 0x2fd   : > { %3672 = vmatpush1.bf16.msra.mxu0 %v4649_v46  ;;  %v4709_v46 = vld [vmem:[#allocation6 + $0x3d0] ss:$8 sps:$4 sm:$0xff]  }
 0x2fe   : > { %3673 = vmatprep.subr.bf16.mxu0 %v4654_v49  ;;  %v1126_v49 = vrot.slane %v5094_v22, %v1125_v44 }
 0x301   : > { %3674 = vmatpush1.bf16.msra.mxu0 %v4652_v50  ;;  %v1130_v50 = vrot.slane %v5094_v22, %v1129_v45 }
 0x302   : > { %3675 = vmatprep.subr.bf16.mxu0 %v4657_v51  ;;  %v4714_v51 = vld [vmem:[#allocation6 + $0x3e4] ss:$8 sps:$4 sm:$0xff]  }
 0x305   : > { %3676 = vmatpush1.bf16.msra.mxu0 %v4655_v52 }
 0x306   : > { %3677 = vmatprep.subr.bf16.mxu0 %v4660_v53 }
 0x309   : > { %3678 = vmatpush1.bf16.msra.mxu0 %v4658_v54 }
 0x30a   : > { %3679 = vmatprep.subr.bf16.mxu0 %v4663_v39  ;;  %v4712_v39 = vld [vmem:[#allocation6 + $0x3e0] ss:$8 sps:$4 sm:$0xff]  }
 0x30d   : > { %3680 = vmatpush1.bf16.msra.mxu0 %v4661_v56  ;;  %v4717_v56 = vld [vmem:[#allocation6 + $0x3f4] ss:$8 sps:$4 sm:$0xff]  }
 0x30e   : > { %v2668_v57 = vpop.f32.mrb[4].mxu0  ;;  %3681 = vmatprep.subr.bf16.mxu0 %v4666_v43 }
 0x30f   : > { %v4349_v58 = vadd.f32 %v2668_v57, %v1118_v47  ;;  %v2670_v59 = vpop.f32.mrb[5].mxu0  ;;  %v4715_v57 = vld [vmem:[#allocation6 + $0x3f0] ss:$8 sps:$4 sm:$0xff]  }
 0x310   : > { %v4350_v60 = vadd.f32 %v2670_v59, %v1122_v2  ;;  %v2672_v61 = vpop.f32.mrb[6].mxu0 }
 0x311   : > { %v4351_v63 = vadd.f32 %v2672_v61, %v1118_v47  ;;  %v2674_v0 = vpop.f32.mrb[7].mxu0  ;;  %3682 = vmatpush1.bf16.msra.mxu0 %v4664_v48  ;;  %v2767_v5 = vmax.f32 %v4349_v58, 0.0 }
 0x312   : > { %v4352_v3 = vadd.f32 %v2674_v0, %v1122_v2  ;;  %3683 = vmatprep.subr.bf16.mxu0 %v4669_v20  ;;  %v2768_v8 = vmax.f32 %v4350_v60, 0.0  ;;  %v2915_v60 = vld [vmem:[%s5137_s6] sm:$0x3] }
 0x313   : > { %v2775_v7 = vmax.f32 %v4351_v63, 0.0  ;;  %v2920_v61 = vrot.slane %v2915_v60, %v5031_v19  ;;  %v2924_v63 = vrot.slane %v2915_v60, %v5039_v21 }
 0x314   : > { %v2776_v9 = vmax.f32 %v4352_v3, 0.0 }
 0x315   : > { %v2783_v11 = vpack.c.bf16 %v2775_v7, %v2767_v5  ;;  %3684 = vmatpush1.bf16.msra.mxu0 %v4667_v1 }
 0x316   : > { %v2784_v16 = vpack.c.bf16 %v2776_v9, %v2768_v8  ;;  %3696 = vmatprep.subr.bf16.mxu0 %v4672_v4 }
 0x318   : > { %3685 = vmatprep.mubr.bf16.mxu0 %v2784_v16 }
 0x319   : > { %3686 = vmatmul.mubr.bf16.vlgmr.msra.gmra.mrb[8].mxu0 %v2783_v11 }
 0x31a   : > { %3697 = vmatpush1.bf16.msra.mxu0 %v4670_v23 }
 0x31b   : > { %3698 = vmatprep.subr.bf16.mxu0 %v4675_v24 }
 0x31e   : > { %3699 = vmatpush1.bf16.msra.mxu0 %v4673_v25 }
 0x31f   : > { %3700 = vmatprep.subr.bf16.mxu0 %v4678_v32 }
 0x322   : > { %3701 = vmatpush1.bf16.msra.mxu0 %v4676_v26 }
 0x323   : > { %3702 = vmatprep.subr.bf16.mxu0 %v4681_v27 }
 0x326   : > { %3703 = vmatpush1.bf16.msra.mxu0 %v4679_v13 }
 0x327   : > { %3704 = vmatprep.subr.bf16.mxu0 %v4684_v33 }
 0x32a   : > { %3705 = vmatpush1.bf16.msra.mxu0 %v4682_v62 }
 0x32b   : > { %3706 = vmatprep.subr.bf16.mxu0 %v4687_v14 }
 0x32e   : > { %3707 = vmatpush1.bf16.msra.mxu0 %v4685_v15 }
 0x32f   : > { %3708 = vmatprep.subr.bf16.mxu0 %v4690_v28 }
 0x332   : > { %3709 = vmatpush1.bf16.msra.mxu0 %v4688_v29 }
 0x333   : > { %3710 = vmatprep.subr.bf16.mxu0 %v4693_v30 }
 0x336   : > { %3711 = vmatpush1.bf16.msra.mxu0 %v4691_v31 }
 0x337   : > { %3712 = vmatprep.subr.bf16.mxu0 %v4696_v34 }
 0x33a   : > { %3713 = vmatpush1.bf16.msra.mxu0 %v4694_v35 }
 0x33b   : > { %3714 = vmatprep.subr.bf16.mxu0 %v4699_v36 }
 0x33e   : > { %3715 = vmatpush1.bf16.msra.mxu0 %v4697_v37 }
 0x33f   : > { %3716 = vmatprep.subr.bf16.mxu0 %v4702_v40 }
 0x342   : > { %3717 = vmatpush1.bf16.msra.mxu0 %v4700_v41 }
 0x343   : > { %3718 = vmatprep.subr.bf16.mxu0 %v4705_v6 }
 0x346   : > { %3719 = vmatpush1.bf16.msra.mxu0 %v4703_v42 }
 0x347   : > { %3720 = vmatprep.subr.bf16.mxu0 %v4708_v10 }
 0x34a   : > { %3721 = vmatpush1.bf16.msra.mxu0 %v4706_v12 }
 0x34b   : > { %3722 = vmatprep.subr.bf16.mxu0 %v4711_v17 }
 0x34d   : > { %v2754_v52 = vpop.f32.mrb[16].mxu1 }
 0x34e   : > { %v4353_v53 = vadd.f32 %v2754_v52, %v1126_v49  ;;  %3723 = vmatpush1.bf16.msra.mxu0 %v4709_v46  ;;  %v2756_v54 = vpop.f32.mrb[17].mxu1 }
 0x34f   : > { %v4354_v55 = vadd.f32 %v2756_v54, %v1130_v50  ;;  %v2758_v38 = vpop.f32.mrb[18].mxu1  ;;  %3724 = vmatprep.subr.bf16.mxu0 %v4714_v51 }
 0x350   : > { %v4355_v43 = vadd.f32 %v2758_v38, %v1126_v49  ;;  %v2760_v47 = vpop.f32.mrb[19].mxu1  ;;  %v2769_v2 = vmax.f32 %v4353_v53, 0.0 }
 0x351   : > { %v4356_v18 = vadd.f32 %v2760_v47, %v1130_v50  ;;  %v2770_v20 = vmax.f32 %v4354_v55, 0.0 }
 0x352   : > { %v2777_v48 = vmax.f32 %v4355_v43, 0.0  ;;  %3725 = vmatpush1.bf16.msra.mxu0 %v4712_v39 }
 0x353   : > { %v2778_v58 = vmax.f32 %v4356_v18, 0.0  ;;  %3726 = vmatprep.subr.bf16.mxu0 %v4717_v56 }
 0x354   : > { %v2785_v22 = vpack.c.bf16 %v2777_v48, %v2769_v2 }
 0x355   : > { %v2786_v59 = vpack.c.bf16 %v2778_v58, %v2770_v20 }
 0x356   : > { %3727 = vmatpush1.bf16.msra.mxu0 %v4715_v57 }
 0x357   : > { %3728 = vmatprep.mubr.bf16.mxu0 %v2786_v59 }
 0x359   : > { %3729 = vmatmul.mubr.bf16.vlgmr.msra.gmra.mrb[8].mxu0 %v2785_v22 }
 0x42c   : > { %v3730_v0 = vpop.f32.mrb[8].mxu0 }
 0x42d   : > { %v4357_v1 = vadd.f32 %v3730_v0, %v2920_v61  ;;  %v3732_v3 = vpop.f32.mrb[9].mxu0 }
 0x42e   : > { %v4358_v4 = vadd.f32 %v3732_v3, %v2924_v63  ;;  %v3734_v5 = vpop.f32.mrb[10].mxu0 }
 0x42f   : > { %v3736_v7 = vpop.f32.mrb[11].mxu0  ;;  %v4359_v8 = vadd.f32 %v3734_v5, %v2920_v61 }
 0x430   : > { %v4360_v9 = vadd.f32 %v3736_v7, %v2924_v63  ;;  %v3739_v11 = vmax.f32 %v4357_v1, %v4358_v4 }
 0x432   : > { %3740 = vmax.xlane.f32.xlu0 %v3739_v11  ;;  %v3742_v16 = vmax.f32 %v4359_v8, %v4360_v9 }
 0x436   : > { %3743 = vmax.xlane.f32.xlu0 %v3742_v16 }
 0x4bf   : > { %v3741_v23 = vpop.xlane.xlu0 %3740 }
 0x4c0   : > { %v3745_v24 = vsub.f32 %v4357_v1, %v3741_v23  ;;  %v3746_v25 = vsub.f32 %v4358_v4, %v3741_v23 }
 0x4c2   : > { %v3749_v32 = vmul.f32 1.442695, %v3745_v24  ;;  %v3751_v26 = vmul.f32 1.442695, %v3746_v25 }
 0x4c3   : > { %v3744_v19 = vpop.xlane.xlu0 %3743 }
 0x4c4   : > { %4718 = vpow2.f32 %v3749_v32  ;;  %v3747_v21 = vsub.f32 %v4359_v8, %v3744_v19  ;;  %v3748_v27 = vsub.f32 %v4360_v9, %v3744_v19 }
 0x4c5   : > { %4720 = vpow2.f32 %v3751_v26 }
 0x4c6   : > { %v3753_v13 = vmul.f32 1.442695, %v3747_v21  ;;  %v3755_v33 = vmul.f32 1.442695, %v3748_v27 }
 0x4c8   : > { %4722 = vpow2.f32 %v3753_v13 }
 0x4c9   : > { %4724 = vpow2.f32 %v3755_v33 }
 0x4ce   : > { %v4719_v62 = vpop.eup %4718 }
 0x4cf   : > { %v4721_v14 = vpop.eup %4720 }
 0x4d0   : > { %v3757_v15 = vadd.f32 %v4721_v14, %v4719_v62 }
 0x4d2   : > { %v4723_v28 = vpop.eup %4722  ;;  %3758 = vadd.xlane.f32.xlu1 %v3757_v15 }
 0x4d3   : > { %v4725_v29 = vpop.eup %4724 }
 0x4d4   : > { %v3760_v30 = vadd.f32 %v4725_v29, %v4723_v28 }
 0x4d6   : > { %3761 = vadd.xlane.f32.xlu1 %v3760_v30 }
 0x55f   : > { %v3759_v31 = vpop.xlane.xlu1 %3758 }
 0x560   : > { %4726 = vrcp.f32 %v3759_v31 }
 0x563   : > { %v3762_v34 = vpop.xlane.xlu1 %3761 }
 0x564   : > { %4728 = vrcp.f32 %v3762_v34 }
 0x56a   : > { %v4727_v35 = vpop.eup %4726 }
 0x56b   : > { %v3765_v36 = vmul.f32 %v4727_v35, %v3759_v31 }
 0x56d   : > { %v3767_v37 = vsub.f32 2.0, %v3765_v36 }
 0x56e   : > { %v4729_v40 = vpop.eup %4728 }
 0x56f   : > { %v3769_v41 = vmul.f32 %v4727_v35, %v3767_v37  ;;  %v3766_v6 = vmul.f32 %v4729_v40, %v3762_v34 }
 0x571   : > { %v3771_v42 = vmul.f32 %v4719_v62, %v3769_v41  ;;  %v3772_v10 = vmul.f32 %v4721_v14, %v3769_v41  ;;  %v3768_v12 = vsub.f32 2.0, %v3766_v6 }
 0x573   : > { %3775 = vst [vmem:[%s329_s30] sm:$0xff] %v3771_v42  ;;  %3776 = vst [vmem:[%s329_s30 + $0x8] sm:$0xff] %v3772_v10  ;;  %v3770_v44 = vmul.f32 %v4729_v40, %v3768_v12 }
 0x575   : > { %v3773_v17 = vmul.f32 %v4723_v28, %v3770_v44  ;;  %v3774_v45 = vmul.f32 %v4725_v29, %v3770_v44 }
 0x577   : > { %3777 = vst [vmem:[%s329_s30 + $0x10] sm:$0xff] %v3773_v17  ;;  %3778 = vst [vmem:[%s329_s30 + $0x18] sm:$0xff] %v3774_v45 }
 0x578 PF: > { %s19_s24 = sadd.s32 1, %s4828_s24  }
 0x579   : > { %p16_p3 = scmp.ge.s32.totalorder %s19_s24, 4  }
 0x57b   :  { %18 = sbr.rel (!%p16_p3) target bundleno = 2 (0x2), region = 91 }
 0x582   :  { %3803 = vsyncpa [#allocation3], 1 }
 0x583   :  { %3805 = vsyncpa [#allocation3 + $0x1], 1 }
 0x584   :  { %3806 = vsyncpa [#allocation5], 1 }

</bundles_post_ra>
